<compile_context>
chip_gen: v7x
topology: tpu7x:2x2x1
jax: 0.10.0
libtpu: 0.0.40
codegen_flags: <defaults>
</compile_context>

<pallas_src>
import functools

import jax
import jax.numpy as jnp
from jax.experimental import pallas as pl
from jax.experimental.pallas import tpu as pltpu

# Layer sizes of the reference PyTorch module.
DIMS = [4, 16, 32, 64, 128, 512, 1]
MAX_WIDTH = 512        # widest layer -> slab column length
SLAB_COLS = 8          # cols: b1,b2,b3,b4,b5, w6-column, b6, pad


def _round_up(n, m):
    return ((n + m - 1) // m) * m


def _mlp_kernel(x_ref, w1, w2, w3, w4, w5, slab_ref, o_ref):
    """Fused forward for one batch tile, feature-major: h is (features, TB)."""
    h = x_ref[...]                                          # (4, TB) bf16

    def layer(h, w_ref, idx, out_dim):
        # (out, in) @ (in, TB) -> (out, TB): bf16 MXU matmul, f32 accumulate.
        y = jnp.dot(w_ref[...], h, preferred_element_type=jnp.float32)
        y = y + slab_ref[0:out_dim, idx:idx + 1]            # f32 bias (VPU), lane-broadcast
        return jnp.maximum(y, 0.0)                          # ReLU in f32

    h = layer(h, w1, 0, 16).astype(jnp.bfloat16)
    h = layer(h, w2, 1, 32).astype(jnp.bfloat16)
    h = layer(h, w3, 2, 64).astype(jnp.bfloat16)
    h = layer(h, w4, 3, 128).astype(jnp.bfloat16)
    h5 = layer(h, w5, 4, 512)                               # (512, TB) f32, stays f32

    # Final 512 -> 1 layer: VPU multiply + sublane reduction (no MXU padding,
    # no padded HBM writeback).  Result is already lane-major.
    w6_col = slab_ref[:, 5:6]                               # (512, 1) f32
    b6 = slab_ref[0:1, 6:7]                                 # (1, 1)   f32
    y = jnp.sum(h5 * w6_col, axis=0, keepdims=True) + b6    # (1, TB)  f32
    o_ref[...] = y.astype(o_ref.dtype)


def init_params(key):
    """PyTorch nn.Linear default init: U(-1/sqrt(fan_in), +1/sqrt(fan_in)).
    Weights stored in PyTorch orientation (out_features, in_features)."""
    params = []
    for i in range(len(DIMS) - 1):
        fan_in, fan_out = DIMS[i], DIMS[i + 1]
        key, kw, kb = jax.random.split(key, 3)
        bound = 1.0 / float(fan_in) ** 0.5
        w = jax.random.uniform(kw, (fan_out, fan_in), jnp.float32, -bound, bound)
        b = jax.random.uniform(kb, (fan_out,), jnp.float32, -bound, bound)
        params.append((w, b))
    return params


def pack_params(params):
    """One-time packing: bf16 weights for layers 1-5 (PyTorch (out,in) layout),
    plus a single (512, 8) f32 slab holding b1..b5 (columns 0-4), the final
    layer's weight as a column (column 5) and its bias scalar at [0, 6]."""
    ws = tuple(jnp.asarray(w, jnp.float32).astype(jnp.bfloat16)
               for w, _ in params[:-1])
    slab = jnp.zeros((MAX_WIDTH, SLAB_COLS), jnp.float32)
    for i, (_, b) in enumerate(params[:-1]):
        b = jnp.asarray(b, jnp.float32).reshape(-1)
        slab = slab.at[: b.shape[0], i].set(b)
    w6, b6 = params[-1]
    slab = slab.at[:, 5].set(jnp.asarray(w6, jnp.float32).reshape(-1))
    slab = slab.at[0, 6].set(jnp.asarray(b6, jnp.float32).reshape(()))
    return ws, slab


@functools.partial(jax.jit, static_argnames=("block_batch",))
def mlp_forward(x, ws, slab, *, block_batch=1024):
    batch = x.shape[0]

    # Batch tile: always a multiple of 128 (lane-dense output blocks, clean
    # bf16 tiles, and it sanitizes any caller-provided block_batch).  Prefer
    # >= 2 grid steps when the batch allows it so v7x's two TensorCores and
    # the input/output DMA pipeline both get work.
    padded128 = _round_up(batch, 128)
    tb = min(_round_up(max(block_batch, 128), 128), padded128)
    if padded128 // tb < 2 and padded128 >= 256:
        tb = _round_up(padded128 // 2, 128)
    padded = _round_up(batch, tb)

    # Feature-major, bf16 input: (4, padded) with batch on the lane axis.
    xt = x.T.astype(jnp.bfloat16)
    if padded != batch:
        xt = jnp.pad(xt, ((0, 0), (0, padded - batch)))

    grid = (padded // tb,)
    in_specs = [pl.BlockSpec((DIMS[0], tb), lambda i: (0, i))]
    in_specs += [pl.BlockSpec(w.shape, lambda i: (0, 0)) for w in ws]   # VMEM-resident
    in_specs.append(pl.BlockSpec(slab.shape, lambda i: (0, 0)))

    out = pl.pallas_call(
        _mlp_kernel,
        out_shape=jax.ShapeDtypeStruct((1, padded), jnp.float32),
        grid=grid,
        in_specs=in_specs,
        out_specs=pl.BlockSpec((1, tb), lambda i: (0, i)),
        compiler_params=pltpu.CompilerParams(
            dimension_semantics=("parallel",)),
    )(xt, *ws, slab)

    # Un-pad and restore the (batch, 1) module output shape.
    return out[0, :batch].reshape(batch, 1)


def mlp_reference(x, params):
    """Plain-JAX f32 reference for sanity checking."""
    h = x
    for i, (w, b) in enumerate(params):
        h = h @ w.T + b
        if i < len(params) - 1:
            h = jnp.maximum(h, 0.0)
    return h


if __name__ == "__main__":
    key = jax.random.PRNGKey(0)
    key_x, key_p = jax.random.split(key)

    params = init_params(key_p)
    ws, slab = pack_params(params)

    # batch=30: single tile + batch-padding path.
    # batch=300: multi-step grid (2 tiles), exercising the parallel batch axis.
    for batch in (30, 300):
        kx = jax.random.fold_in(key_x, batch)
        x = jax.random.normal(kx, (batch, DIMS[0]), jnp.float32)

        out = jax.block_until_ready(mlp_forward(x, ws, slab))
        ref = mlp_reference(x, params)

        assert out.shape == (batch, DIMS[-1]), out.shape
        err = float(jnp.max(jnp.abs(out - ref)))
        # bf16 matmul inputs with f32 accumulation -> tolerance loosened vs pure f32.
        assert jnp.allclose(out, ref, atol=2e-2, rtol=2e-2), \
            f"batch={batch} max abs err {err}"

    print("KERNEL_OK")
</pallas_src>

<mosaic_0001>
module attributes {stable_mosaic.version = 11 : i64} {
  func.func @_mlp_kernel(%arg0: i32, %arg1: memref<4x128xbf16, #tpu.memory_space<vmem>>, %arg2: memref<16x4xbf16, #tpu.memory_space<vmem>>, %arg3: memref<32x16xbf16, #tpu.memory_space<vmem>>, %arg4: memref<64x32xbf16, #tpu.memory_space<vmem>>, %arg5: memref<128x64xbf16, #tpu.memory_space<vmem>>, %arg6: memref<512x128xbf16, #tpu.memory_space<vmem>>, %arg7: memref<512x8xf32, #tpu.memory_space<vmem>>, %arg8: memref<1x128xf32, #tpu.memory_space<vmem>>) attributes {dimension_semantics = [#tpu.dimension_semantics<parallel>], iteration_bounds = array<i64: 1>, scalar_prefetch = 0 : i64, scratch_operands = 0 : i64, tpu.core_type = #tpu.core_type<tc>, window_params = [{transform_indices = @transform_0, window_bounds = array<i64: 4, 128>}, {pipeline_mode = #tpu.pipeline_mode<synchronous>, transform_indices = @transform_1, window_bounds = array<i64: 16, 4>}, {pipeline_mode = #tpu.pipeline_mode<synchronous>, transform_indices = @transform_2, window_bounds = array<i64: 32, 16>}, {pipeline_mode = #tpu.pipeline_mode<synchronous>, transform_indices = @transform_3, window_bounds = array<i64: 64, 32>}, {pipeline_mode = #tpu.pipeline_mode<synchronous>, transform_indices = @transform_4, window_bounds = array<i64: 128, 64>}, {pipeline_mode = #tpu.pipeline_mode<synchronous>, transform_indices = @transform_5, window_bounds = array<i64: 512, 128>}, {pipeline_mode = #tpu.pipeline_mode<synchronous>, transform_indices = @transform_6, window_bounds = array<i64: 512, 8>}, {transform_indices = @transform_7, window_bounds = array<i64: 1, 128>}]} {
    %c0 = arith.constant 0 : index
    %c0_0 = arith.constant 0 : index
    %0 = vector.load %arg1[%c0, %c0_0] : memref<4x128xbf16, #tpu.memory_space<vmem>>, vector<4x128xbf16>
    %c0_1 = arith.constant 0 : index
    %c0_2 = arith.constant 0 : index
    %1 = vector.load %arg2[%c0_1, %c0_2] : memref<16x4xbf16, #tpu.memory_space<vmem>>, vector<16x4xbf16>
    %cst = arith.constant dense<0.000000e+00> : vector<16x128xf32>
    %2 = tpu.matmul %1, %0, %cst {dimension_numbers = #tpu.dot_dimension_numbers<[1], [0], [0], [1], [0, 0, 1, 1], [], []>} : vector<16x4xbf16>, vector<4x128xbf16>, vector<16x128xf32> -> vector<16x128xf32>
    %c0_3 = arith.constant 0 : index
    %c0_4 = arith.constant 0 : index
    %3 = vector.load %arg7[%c0_3, %c0_4] : memref<512x8xf32, #tpu.memory_space<vmem>>, vector<16x1xf32>
    %4 = vector.broadcast %3 : vector<16x1xf32> to vector<16x128xf32>
    %5 = arith.addf %2, %4 : vector<16x128xf32>
    %cst_5 = arith.constant 0.000000e+00 : f32
    %6 = vector.broadcast %cst_5 : f32 to vector<16x128xf32>
    %7 = arith.maximumf %5, %6 : vector<16x128xf32>
    %8 = arith.truncf %7 : vector<16x128xf32> to vector<16x128xbf16>
    %c0_6 = arith.constant 0 : index
    %c0_7 = arith.constant 0 : index
    %9 = vector.load %arg3[%c0_6, %c0_7] : memref<32x16xbf16, #tpu.memory_space<vmem>>, vector<32x16xbf16>
    %cst_8 = arith.constant dense<0.000000e+00> : vector<32x128xf32>
    %10 = tpu.matmul %9, %8, %cst_8 {dimension_numbers = #tpu.dot_dimension_numbers<[1], [0], [0], [1], [0, 0, 1, 1], [], []>} : vector<32x16xbf16>, vector<16x128xbf16>, vector<32x128xf32> -> vector<32x128xf32>
    %c0_9 = arith.constant 0 : index
    %c1 = arith.constant 1 : index
    %11 = vector.load %arg7[%c0_9, %c1] : memref<512x8xf32, #tpu.memory_space<vmem>>, vector<32x1xf32>
    %12 = vector.broadcast %11 : vector<32x1xf32> to vector<32x128xf32>
    %13 = arith.addf %10, %12 : vector<32x128xf32>
    %cst_10 = arith.constant 0.000000e+00 : f32
    %14 = vector.broadcast %cst_10 : f32 to vector<32x128xf32>
    %15 = arith.maximumf %13, %14 : vector<32x128xf32>
    %16 = arith.truncf %15 : vector<32x128xf32> to vector<32x128xbf16>
    %c0_11 = arith.constant 0 : index
    %c0_12 = arith.constant 0 : index
    %17 = vector.load %arg4[%c0_11, %c0_12] : memref<64x32xbf16, #tpu.memory_space<vmem>>, vector<64x32xbf16>
    %cst_13 = arith.constant dense<0.000000e+00> : vector<64x128xf32>
    %18 = tpu.matmul %17, %16, %cst_13 {dimension_numbers = #tpu.dot_dimension_numbers<[1], [0], [0], [1], [0, 0, 1, 1], [], []>} : vector<64x32xbf16>, vector<32x128xbf16>, vector<64x128xf32> -> vector<64x128xf32>
    %c0_14 = arith.constant 0 : index
    %c2 = arith.constant 2 : index
    %19 = vector.load %arg7[%c0_14, %c2] : memref<512x8xf32, #tpu.memory_space<vmem>>, vector<64x1xf32>
    %20 = vector.broadcast %19 : vector<64x1xf32> to vector<64x128xf32>
    %21 = arith.addf %18, %20 : vector<64x128xf32>
    %cst_15 = arith.constant 0.000000e+00 : f32
    %22 = vector.broadcast %cst_15 : f32 to vector<64x128xf32>
    %23 = arith.maximumf %21, %22 : vector<64x128xf32>
    %24 = arith.truncf %23 : vector<64x128xf32> to vector<64x128xbf16>
    %c0_16 = arith.constant 0 : index
    %c0_17 = arith.constant 0 : index
    %25 = vector.load %arg5[%c0_16, %c0_17] : memref<128x64xbf16, #tpu.memory_space<vmem>>, vector<128x64xbf16>
    %cst_18 = arith.constant dense<0.000000e+00> : vector<128x128xf32>
    %26 = tpu.matmul %25, %24, %cst_18 {dimension_numbers = #tpu.dot_dimension_numbers<[1], [0], [0], [1], [0, 0, 1, 1], [], []>} : vector<128x64xbf16>, vector<64x128xbf16>, vector<128x128xf32> -> vector<128x128xf32>
    %c0_19 = arith.constant 0 : index
    %c3 = arith.constant 3 : index
    %27 = vector.load %arg7[%c0_19, %c3] : memref<512x8xf32, #tpu.memory_space<vmem>>, vector<128x1xf32>
    %28 = vector.broadcast %27 : vector<128x1xf32> to vector<128x128xf32>
    %29 = arith.addf %26, %28 : vector<128x128xf32>
    %cst_20 = arith.constant 0.000000e+00 : f32
    %30 = vector.broadcast %cst_20 : f32 to vector<128x128xf32>
    %31 = arith.maximumf %29, %30 : vector<128x128xf32>
    %32 = arith.truncf %31 : vector<128x128xf32> to vector<128x128xbf16>
    %c0_21 = arith.constant 0 : index
    %c0_22 = arith.constant 0 : index
    %33 = vector.load %arg6[%c0_21, %c0_22] : memref<512x128xbf16, #tpu.memory_space<vmem>>, vector<512x128xbf16>
    %cst_23 = arith.constant dense<0.000000e+00> : vector<512x128xf32>
    %34 = tpu.matmul %33, %32, %cst_23 {dimension_numbers = #tpu.dot_dimension_numbers<[1], [0], [0], [1], [0, 0, 1, 1], [], []>} : vector<512x128xbf16>, vector<128x128xbf16>, vector<512x128xf32> -> vector<512x128xf32>
    %c0_24 = arith.constant 0 : index
    %c4 = arith.constant 4 : index
    %35 = vector.load %arg7[%c0_24, %c4] : memref<512x8xf32, #tpu.memory_space<vmem>>, vector<512x1xf32>
    %36 = vector.broadcast %35 : vector<512x1xf32> to vector<512x128xf32>
    %37 = arith.addf %34, %36 : vector<512x128xf32>
    %cst_25 = arith.constant 0.000000e+00 : f32
    %38 = vector.broadcast %cst_25 : f32 to vector<512x128xf32>
    %39 = arith.maximumf %37, %38 : vector<512x128xf32>
    %c0_26 = arith.constant 0 : index
    %c5 = arith.constant 5 : index
    %40 = vector.load %arg7[%c0_26, %c5] : memref<512x8xf32, #tpu.memory_space<vmem>>, vector<512x1xf32>
    %c0_27 = arith.constant 0 : index
    %c6 = arith.constant 6 : index
    %41 = vector.load %arg7[%c0_27, %c6] : memref<512x8xf32, #tpu.memory_space<vmem>>, vector<1x1xf32>
    %42 = vector.broadcast %40 : vector<512x1xf32> to vector<512x128xf32>
    %43 = arith.mulf %39, %42 : vector<512x128xf32>
    %cst_28 = arith.constant dense<0.000000e+00> : vector<128xf32>
    %44 = vector.multi_reduction <add>, %43, %cst_28 [0] : vector<512x128xf32> to vector<128xf32>
    %45 = vector.shape_cast %44 : vector<128xf32> to vector<1x128xf32>
    %46 = vector.broadcast %41 : vector<1x1xf32> to vector<1x128xf32>
    %47 = arith.addf %45, %46 : vector<1x128xf32>
    %c0_29 = arith.constant 0 : index
    %c0_30 = arith.constant 0 : index
    %48 = vector.load %arg8[%c0_29, %c0_30] : memref<1x128xf32, #tpu.memory_space<vmem>>, vector<1x128xf32>
    tpu.vector_store %arg8[%c0_29, %c0_30], %47 {strides = array<i32>} : memref<1x128xf32, #tpu.memory_space<vmem>>, vector<1x128xf32>,
    return
  }
  func.func @transform_0(%arg0: i32) -> (i32, i32) {
    %c0_i32 = arith.constant 0 : i32
    %c0_i32_0 = arith.constant 0 : i32
    return %c0_i32, %arg0 : i32, i32
  }
  func.func @transform_1(%arg0: i32) -> (i32, i32) {
    %c0_i32 = arith.constant 0 : i32
    %c0_i32_0 = arith.constant 0 : i32
    %c0_i32_1 = arith.constant 0 : i32
    return %c0_i32, %c0_i32_0 : i32, i32
  }
  func.func @transform_2(%arg0: i32) -> (i32, i32) {
    %c0_i32 = arith.constant 0 : i32
    %c0_i32_0 = arith.constant 0 : i32
    %c0_i32_1 = arith.constant 0 : i32
    return %c0_i32, %c0_i32_0 : i32, i32
  }
  func.func @transform_3(%arg0: i32) -> (i32, i32) {
    %c0_i32 = arith.constant 0 : i32
    %c0_i32_0 = arith.constant 0 : i32
    %c0_i32_1 = arith.constant 0 : i32
    return %c0_i32, %c0_i32_0 : i32, i32
  }
  func.func @transform_4(%arg0: i32) -> (i32, i32) {
    %c0_i32 = arith.constant 0 : i32
    %c0_i32_0 = arith.constant 0 : i32
    %c0_i32_1 = arith.constant 0 : i32
    return %c0_i32, %c0_i32_0 : i32, i32
  }
  func.func @transform_5(%arg0: i32) -> (i32, i32) {
    %c0_i32 = arith.constant 0 : i32
    %c0_i32_0 = arith.constant 0 : i32
    %c0_i32_1 = arith.constant 0 : i32
    return %c0_i32, %c0_i32_0 : i32, i32
  }
  func.func @transform_6(%arg0: i32) -> (i32, i32) {
    %c0_i32 = arith.constant 0 : i32
    %c0_i32_0 = arith.constant 0 : i32
    %c0_i32_1 = arith.constant 0 : i32
    return %c0_i32, %c0_i32_0 : i32, i32
  }
  func.func @transform_7(%arg0: i32) -> (i32, i32) {
    %c0_i32 = arith.constant 0 : i32
    %c0_i32_0 = arith.constant 0 : i32
    return %c0_i32, %arg0 : i32, i32
  }
}

</mosaic_0001>

<bundles_post_ra>
// kernel: mlp_forward.1
= control target key start
LH: loop header
LB: loop body
LE: loop exit
PB: predicated region body
PF: predicated region fallthrough
CT: control target
= control target key end

     0   :  { %vm51_vm0 = vcmask 1041408   ;;  %v2395_v0 = vmov 0.0   ;;  %vm2396_vm1 = vmmov 0   ;;  %vm47_vm2 = vcmask 31744   ;;  %s3515_s0 = inlined_call_operand.vmem [shape: bf16[4,128], index: 0, kind: input, shape index: {}]   ;;  %s3516_s1 = inlined_call_operand.vmem [shape: bf16[16,4], index: 1, kind: input, shape index: {}]   ;;  %s3517_s6 = inlined_call_operand.vmem [shape: f32[512,8], index: 6, kind: input, shape index: {}]   ;;  %s3518_s2 = inlined_call_operand.vmem [shape: bf16[32,16], index: 2, kind: input, shape index: {}]   ;;  %s3519_s3 = inlined_call_operand.vmem [shape: bf16[64,32], index: 3, kind: input, shape index: {}]   ;;  %s3520_s4 = inlined_call_operand.vmem [shape: bf16[128,64], index: 4, kind: input, shape index: {}]   ;;  %s3521_s5 = inlined_call_operand.vmem [shape: bf16[512,128], index: 5, kind: input, shape index: {}]   ;;  %s3522_s7 = inlined_call_operand.vmem [shape: f32[1,128], index: 7, kind: output, shape index: {}]  }
   0x1   :  { %2182 = vmatprep.subr.bf16.mxu0 %v2395_v0  ;;  %v27_v1 = vld [vmem:[%s3515_s0] sm:$0x3]  ;;  %2184 = vmatprep.mubr.msk.bf16.mxu0 %vm2396_vm1, %v2395_v0  ;;  %v2397_v5 = vmov 0   ;;  %v2459_v6 = vld [vmem:[%s3517_s6 + $0x8] sm:$0xff]  ;;  %vm137_vm3 = vcmask 130048   ;;  %v2469_v8 = vld [vmem:[%s3517_s6 + $0x10] sm:$0xff] }
   0x2   :  { %v53_v2 = vsel %vm51_vm0, %v27_v1, 0  ;;  %v2348_v3 = vld [vmem:[%s3516_s1] sm:$0xff]   ;;  %2335 = vset.pattern.permute.xlu0 %v2397_v5  ;;  %v2398_v9 = vmov 1   ;;  %v2477_v10 = vld [vmem:[%s3517_s6 + $0x18] sm:$0xff]  ;;  %v2350_v22 = vld [vmem:[%s3518_s2 + $0x8] sm:$0xff]   ;;  %vm275_vm4 = vcmask 261120  }
   0x3   :  { %v2453_v4 = vld [vmem:[%s3517_s6] sm:$0xff]  ;;  %2183 = vmatpush3.bf16.msra.mxu0 %v53_v2  ;;  %2336 = vset.pattern.permute.xlu1 %v2398_v9  ;;  %v2399_v24 = vmov 2   ;;  %v2500_v26 = vld [vmem:[%s3517_s6 + $0x30] sm:$0xff]  ;;  %v2507_v27 = vld [vmem:[%s3517_s6 + $0x28] sm:$0xff]  ;;  %vm517_vm5 = vcmask 523264   ;;  %v2400_v51 = vmov 3  }
   0x4   :  { %34 = vperm.xlu0 %2335, %v2453_v4   ;;  %v2349_v7 = vld [vmem:[%s3518_s2] sm:$0xff]   ;;  %109 = vperm.xlu1 %2336, %v2453_v4   ;;  %v2513_v28 = vld [vmem:[%s3517_s6 + $0x38] sm:$0xff]  ;;  %v2352_v47 = vld [vmem:[%s3519_s3 + $0x8] sm:$0xff]   ;;  %v2401_v60 = vmov 4  }
   0x5   :  { %2190 = vmatprep.mubr.msk.bf16.mxu1 %vm137_vm3, %v2349_v7  ;;  %v2351_v23 = vld [vmem:[%s3519_s3] sm:$0xff]   ;;  %v2353_v48 = vld [vmem:[%s3519_s3 + $0x10] sm:$0xff]   ;;  %v2354_v49 = vld [vmem:[%s3519_s3 + $0x18] sm:$0xff]  }
   0x6   :  { %2185 = vmatmul.mubr.msk.bf16.vlgmr.msra.gmra.mrb[0].mxu0 %vm47_vm2, %v2348_v3  ;;  %v2493_v25 = vld [vmem:[%s3517_s6 + $0x20] sm:$0xff]  ;;  %v2548_v53 = vld [vmem:[%s3517_s6 + $0x48] sm:$0xff]  ;;  %v2555_v54 = vld [vmem:[%s3517_s6 + $0x50] sm:$0xff] }
   0x7   :  { %2198 = vmatprep.mubr.msk.bf16.mxu0 %vm275_vm4, %v2351_v23  ;;  %v2355_v50 = vld [vmem:[%s3520_s4] sm:$0xff]   ;;  %v2560_v55 = vld [vmem:[%s3517_s6 + $0x58] sm:$0xff]  ;;  %v2572_v57 = vld [vmem:[%s3517_s6 + $0x68] sm:$0xff] }
   0x8   :  { %39 = vperm.xlu0 %2335, %v2459_v6   ;;  %114 = vperm.xlu1 %2336, %v2459_v6   ;;  %v2543_v52 = vld [vmem:[%s3517_s6 + $0x40] sm:$0xff]  ;;  %v2579_v58 = vld [vmem:[%s3517_s6 + $0x70] sm:$0xff]  ;;  %v2584_v59 = vld [vmem:[%s3517_s6 + $0x78] sm:$0xff] }
   0x9   :  { %v2567_v56 = vld [vmem:[%s3517_s6 + $0x60] sm:$0xff]  ;;  %v2612_v63 = vld [vmem:[%s3517_s6 + $0x90] sm:$0xff]  ;;  %v2619_v0 = vld [vmem:[%s3517_s6 + $0x88] sm:$0xff] }
   0xa   :  { %v2605_v61 = vld [vmem:[%s3517_s6 + $0x80] sm:$0xff]  ;;  %v2631_v3 = vld [vmem:[%s3517_s6 + $0x98] sm:$0xff]  ;;  %v2636_v5 = vld [vmem:[%s3517_s6 + $0xb0] sm:$0xff] }
   0xb   :  { %v2624_v1 = vld [vmem:[%s3517_s6 + $0xa0] sm:$0xff] }
   0xc   :  { %2337 = vset.pattern.permute.xlu0 %v2398_v9  ;;  %124 = vperm.xlu1 %2336, %v2477_v10  }
   0xd   :  { %119 = vperm.xlu0 %2337, %v2469_v8  }
  0x10   :  { %2338 = vset.pattern.permute.xlu1 %v2399_v24 }
  0x11   :  { %2339 = vset.pattern.permute.xlu0 %v2399_v24  ;;  %217 = vperm.xlu1 %2338, %v2453_v4  }
  0x12   :  { %222 = vperm.xlu0 %2339, %v2459_v6  }
  0x15   :  { %227 = vperm.xlu1 %2338, %v2469_v8  }
  0x16   :  { %237 = vperm.xlu0 %2339, %v2493_v25  }
  0x19   :  { %232 = vperm.xlu1 %2338, %v2477_v10  }
  0x1a   :  { %247 = vperm.xlu0 %2339, %v2500_v26  }
  0x1d   :  { %242 = vperm.xlu1 %2338, %v2507_v27  }
  0x1e   :  { %2340 = vset.pattern.permute.xlu0 %v2400_v51 }
  0x1f   :  { %399 = vperm.xlu0 %2340, %v2453_v4  }
  0x21   :  { %252 = vperm.xlu1 %2338, %v2513_v28  }
  0x23   :  { %414 = vperm.xlu0 %2340, %v2477_v10  }
  0x25   :  { %2341 = vset.pattern.permute.xlu1 %v2400_v51 }
  0x26   :  { %404 = vperm.xlu1 %2341, %v2459_v6  }
  0x27   :  { %424 = vperm.xlu0 %2340, %v2507_v27  }
  0x2a   :  { %409 = vperm.xlu1 %2341, %v2469_v8  }
  0x2b   :  { %434 = vperm.xlu0 %2340, %v2513_v28  }
  0x2e   :  { %419 = vperm.xlu1 %2341, %v2493_v25  }
  0x2f   :  { %444 = vperm.xlu0 %2340, %v2548_v53  }
  0x32   :  { %429 = vperm.xlu1 %2341, %v2500_v26  }
  0x33   :  { %454 = vperm.xlu0 %2340, %v2560_v55  }
  0x36   :  { %439 = vperm.xlu1 %2341, %v2543_v52  }
  0x37   :  { %464 = vperm.xlu0 %2340, %v2572_v57  }
  0x3a   :  { %449 = vperm.xlu1 %2341, %v2555_v54  }
  0x3b   :  { %474 = vperm.xlu0 %2340, %v2584_v59  }
  0x3e   :  { %459 = vperm.xlu1 %2341, %v2567_v56  }
  0x3f   :  { %2343 = vset.pattern.permute.xlu0 %v2401_v60 }
  0x40   :  { %798 = vperm.xlu0 %2343, %v2459_v6  }
  0x42   :  { %469 = vperm.xlu1 %2341, %v2579_v58  }
  0x44   :  { %813 = vperm.xlu0 %2343, %v2493_v25  }
  0x46   :  { %2342 = vset.pattern.permute.xlu1 %v2401_v60 }
  0x47   :  { %793 = vperm.xlu1 %2342, %v2453_v4  }
  0x48   :  { %823 = vperm.xlu0 %2343, %v2500_v26  }
  0x4b   :  { %803 = vperm.xlu1 %2342, %v2469_v8  }
  0x4c   :  { %833 = vperm.xlu0 %2343, %v2543_v52  }
  0x4f   :  { %808 = vperm.xlu1 %2342, %v2477_v10  }
  0x50   :  { %843 = vperm.xlu0 %2343, %v2555_v54  }
  0x53   :  { %818 = vperm.xlu1 %2342, %v2507_v27  }
  0x54   :  { %853 = vperm.xlu0 %2343, %v2567_v56  }
  0x57   :  { %828 = vperm.xlu1 %2342, %v2513_v28  }
  0x58   :  { %863 = vperm.xlu0 %2343, %v2579_v58  }
  0x5b   :  { %838 = vperm.xlu1 %2342, %v2548_v53  }
  0x5c   :  { %873 = vperm.xlu0 %2343, %v2605_v61  }
  0x5f   :  { %848 = vperm.xlu1 %2342, %v2560_v55  }
  0x60   :  { %883 = vperm.xlu0 %2343, %v2612_v63  }
  0x63   :  { %858 = vperm.xlu1 %2342, %v2572_v57  }
  0x64   :  { %893 = vperm.xlu0 %2343, %v2624_v1  }
  0x67   :  { %868 = vperm.xlu1 %2342, %v2584_v59  }
  0x68   :  { %903 = vperm.xlu0 %2343, %v2636_v5  }
  0x6b   :  { %878 = vperm.xlu1 %2342, %v2619_v0  }
  0x6f   :  { %888 = vperm.xlu1 %2342, %v2631_v3  }
  0x83   :  { %v35_v11 = vpop.permute.xlu0 %34  ;;  %v110_v29 = vpop.permute.xlu1 %109 }
  0x87   :  { %v40_v15 = vpop.permute.xlu0 %39  ;;  %v115_v30 = vpop.permute.xlu1 %114 }
  0x8b   :  { %v125_v35 = vpop.permute.xlu1 %124 }
  0x8c   :  { %v120_v31 = vpop.permute.xlu0 %119 }
  0x90   :  { %v218_v62 = vpop.permute.xlu1 %217 }
  0x91   :  { %v223_v7 = vpop.permute.xlu0 %222 }
  0x94   :  { %v228_v2 = vpop.permute.xlu1 %227 }
  0x98   :  { %v233_v9 = vpop.permute.xlu1 %232 }
  0x9c   :  { %v243_v23 = vpop.permute.xlu1 %242 }
  0xd9   :  { %v89_v12 = vpop.f32.mrb[0].mxu0 }
  0xda   :  { %v90_v13 = vadd.f32 %v89_v12, %v35_v11  ;;  %v2186_v14 = vpop.f32.mrb[1].mxu0  ;;  %v2643_v11 = vld [vmem:[%s3517_s6 + $0xa8] sm:$0xff]  ;;  %v2648_v12 = vld [vmem:[%s3517_s6 + $0xc0] sm:$0xff] }
  0xdb   :  { %v92_v16 = vpop.f32.mrb[2].mxu0  ;;  %898 = vperm.xlu1 %2342, %v2643_v11   ;;  %913 = vperm.xlu0 %2343, %v2648_v12  }
  0xdc   :  { %v93_v17 = vadd.f32 %v92_v16, %v40_v15  ;;  %v2187_v18 = vpop.f32.mrb[3].mxu0  ;;  %v96_v19 = vmax.f32 %v90_v13, 0.0  ;;  %v238_v16 = vpop.permute.xlu0 %237 }
  0xde   :  { %v97_v20 = vmax.f32 %v93_v17, 0.0 }
  0xe0   :  { %v98_v21 = vpack.c.bf16 %v97_v20, %v96_v19  ;;  %v2655_v19 = vld [vmem:[%s3517_s6 + $0xb8] sm:$0xff]  ;;  %v2660_v20 = vld [vmem:[%s3517_s6 + $0xd0] sm:$0xff] }
  0xe1   :  { %908 = vperm.xlu1 %2342, %v2655_v19   ;;  %923 = vperm.xlu0 %2343, %v2660_v20  }
  0xe2   :  { %2188 = vmatprep.subr.bf16.mxu1 %v98_v21 }
  0xe3   :  { %2189 = vmatpush3.bf16.msra.mxu1 %v98_v21 }
  0xe6   :  { %2191 = vmatmul.mubr.msk.bf16.vlgmr.msra.gmra.mrb[0].mxu1 %vm137_vm3, %v2350_v22 }
  0xe7   :  { %2214 = vmatprep.mubr.msk.bf16.mxu1 %vm517_vm5, %v2355_v50 }
 0x1b9   :  { %v2192_v32 = vpop.f32.mrb[0].mxu1 }
 0x1ba   :  { %v187_v33 = vadd.f32 %v2192_v32, %v120_v31  ;;  %v178_v34 = vpop.f32.mrb[1].mxu1 }
 0x1bb   :  { %v179_v36 = vadd.f32 %v178_v34, %v110_v29  ;;  %v2193_v37 = vpop.f32.mrb[2].mxu1  ;;  %v2672_v34 = vld [vmem:[%s3517_s6 + $0xe0] sm:$0xff] }
 0x1bc   :  { %v190_v38 = vadd.f32 %v2193_v37, %v125_v35  ;;  %v181_v39 = vpop.f32.mrb[3].mxu1  ;;  %v195_v41 = vmax.f32 %v187_v33, 0.0  ;;  %v2667_v33 = vld [vmem:[%s3517_s6 + $0xc8] sm:$0xff]  ;;  %v248_v37 = vpop.permute.xlu0 %247  ;;  %933 = vperm.xlu0 %2343, %v2672_v34  }
 0x1bd   :  { %v182_v40 = vadd.f32 %v181_v39, %v115_v30  ;;  %v193_v43 = vmax.f32 %v179_v36, 0.0  ;;  %918 = vperm.xlu1 %2342, %v2667_v33  }
 0x1be   :  { %v196_v42 = vmax.f32 %v190_v38, 0.0 }
 0x1bf   :  { %v194_v44 = vmax.f32 %v182_v40, 0.0 }
 0x1c0   :  { %v198_v45 = vpack.c.bf16 %v196_v42, %v195_v41  ;;  %v253_v41 = vpop.permute.xlu1 %252 }
 0x1c1   :  { %v197_v46 = vpack.c.bf16 %v194_v44, %v193_v43  ;;  %v2679_v44 = vld [vmem:[%s3517_s6 + $0xd8] sm:$0xff] }
 0x1c2   :  { %928 = vperm.xlu1 %2342, %v2679_v44  }
 0x1c3   :  { %2194 = vmatprep.subr.bf16.mxu0 %v197_v46 }
 0x1c4   :  { %2195 = vmatpush3.bf16.msra.mxu0 %v197_v46 }
 0x1c5   :  { %2196 = vmatprep.subr.bf16.mxu0 %v198_v45 }
 0x1c8   :  { %2197 = vmatpush3.bf16.msra.mxu0 %v198_v45  ;;  %v2684_v45 = vld [vmem:[%s3517_s6 + $0xf0] sm:$0xff] }
 0x1c9   :  { %943 = vperm.xlu0 %2343, %v2684_v45  }
 0x1cb   :  { %2199 = vmatmul.mubr.msk.bf16.vlgmr.msra.gmra.mrb[4].mxu0 %vm275_vm4, %v2352_v47 }
 0x1cc   :  { %2202 = vmatprep.mubr.msk.bf16.mxu0 %vm275_vm4, %v2353_v48 }
 0x1d3   :  { %2203 = vmatmul.mubr.msk.bf16.gmra.mrb[8].mxu0 %vm275_vm4, %v2354_v49 }
 0x29e   :  { %v2200_v13 = vpop.f32.mrb[4].mxu0 }
 0x29f   :  { %v331_v14 = vadd.f32 %v2200_v13, %v228_v2  ;;  %v322_v15 = vpop.f32.mrb[5].mxu0  ;;  %v2696_v2 = vld [vmem:[%s3517_s6 + $0x100] sm:$0xff]  ;;  %v2703_v13 = vld [vmem:[%s3517_s6 + $0xf8] sm:$0xff] }
 0x2a0   :  { %v323_v17 = vadd.f32 %v322_v15, %v218_v62  ;;  %v2201_v18 = vpop.f32.mrb[6].mxu0  ;;  %v2691_v62 = vld [vmem:[%s3517_s6 + $0xe8] sm:$0xff]  ;;  %953 = vperm.xlu0 %2343, %v2696_v2  }
 0x2a1   :  { %v334_v21 = vadd.f32 %v2201_v18, %v233_v9  ;;  %v325_v22 = vpop.f32.mrb[7].mxu0  ;;  %v355_v29 = vmax.f32 %v331_v14, 0.0  ;;  %938 = vperm.xlu1 %2342, %v2691_v62   ;;  %v2708_v14 = vld [vmem:[%s3517_s6 + $0x110] sm:$0xff]  ;;  %v2356_v15 = vld [vmem:[%s3520_s4 + $0x8] sm:$0xff]  }
 0x2a2   :  { %v326_v24 = vadd.f32 %v325_v22, %v223_v7  ;;  %v353_v31 = vmax.f32 %v323_v17, 0.0  ;;  %v2723_v17 = vld [vmem:[%s3517_s6 + $0x120] sm:$0xff]  ;;  %v2357_v18 = vld [vmem:[%s3520_s4 + $0x10] sm:$0xff]  }
 0x2a3   :  { %v356_v30 = vmax.f32 %v334_v21, 0.0  ;;  %v2734_v21 = vld [vmem:[%s3517_s6 + $0x118] sm:$0xff]  ;;  %v2739_v22 = vld [vmem:[%s3517_s6 + $0x130] sm:$0xff] }
 0x2a4   :  { %v354_v32 = vmax.f32 %v326_v24, 0.0  ;;  %963 = vperm.xlu0 %2343, %v2708_v14   ;;  %v2750_v24 = vld [vmem:[%s3517_s6 + $0x128] sm:$0xff] }
 0x2a5   :  { %v362_v35 = vpack.c.bf16 %v356_v30, %v355_v29  ;;  %948 = vperm.xlu1 %2342, %v2703_v13   ;;  %v2755_v29 = vld [vmem:[%s3517_s6 + $0x140] sm:$0xff] }
 0x2a6   :  { %v361_v36 = vpack.c.bf16 %v354_v32, %v353_v31  ;;  %v2204_v38 = vpop.f32.mrb[8].mxu0  ;;  %v2359_v30 = vld [vmem:[%s3520_s4 + $0x20] sm:$0xff]   ;;  %v2766_v31 = vld [vmem:[%s3517_s6 + $0x138] sm:$0xff]  ;;  %v2771_v32 = vld [vmem:[%s3517_s6 + $0x150] sm:$0xff] }
 0x2a7   :  { %v347_v39 = vadd.f32 %v2204_v38, %v248_v37  ;;  %v338_v40 = vpop.f32.mrb[9].mxu0  ;;  %v2787_v37 = vld [vmem:[%s3517_s6 + $0x160] sm:$0xff]  ;;  %v2361_v38 = vld [vmem:[%s3520_s4 + $0x30] sm:$0xff]  }
 0x2a8   :  { %v339_v42 = vadd.f32 %v338_v40, %v238_v16  ;;  %v2205_v43 = vpop.f32.mrb[10].mxu0  ;;  %2206 = vmatprep.subr.bf16.mxu1 %v361_v36  ;;  %v2718_v16 = vld [vmem:[%s3517_s6 + $0x108] sm:$0xff]  ;;  %973 = vperm.xlu0 %2343, %v2723_v17   ;;  %v2803_v40 = vld [vmem:[%s3517_s6 + $0x170] sm:$0xff] }
 0x2a9   :  { %v350_v46 = vadd.f32 %v2205_v43, %v253_v41  ;;  %v341_v47 = vpop.f32.mrb[11].mxu0  ;;  %2207 = vmatpush3.bf16.msra.mxu1 %v361_v36  ;;  %v359_v49 = vmax.f32 %v347_v39, 0.0  ;;  %958 = vperm.xlu1 %2342, %v2718_v16   ;;  %v2782_v36 = vld [vmem:[%s3517_s6 + $0x148] sm:$0xff]  ;;  %v2798_v39 = vld [vmem:[%s3517_s6 + $0x158] sm:$0xff]  ;;  %v2819_v43 = vld [vmem:[%s3517_s6 + $0x180] sm:$0xff] }
 0x2aa   :  { %v342_v48 = vadd.f32 %v341_v47, %v243_v23  ;;  %2208 = vmatprep.subr.bf16.mxu1 %v362_v35  ;;  %v357_v51 = vmax.f32 %v339_v42, 0.0  ;;  %v2358_v23 = vld [vmem:[%s3520_s4 + $0x18] sm:$0xff]   ;;  %v2814_v42 = vld [vmem:[%s3517_s6 + $0x168] sm:$0xff]  ;;  %v2832_v47 = vld [vmem:[%s3517_s6 + $0x190] sm:$0xff] }
 0x2ab   :  { %v360_v50 = vmax.f32 %v350_v46, 0.0  ;;  %v2362_v41 = vld [vmem:[%s3520_s4 + $0x38] sm:$0xff]  }
 0x2ac   :  { %v358_v60 = vmax.f32 %v342_v48, 0.0  ;;  %983 = vperm.xlu0 %2343, %v2739_v22   ;;  %v2827_v46 = vld [vmem:[%s3517_s6 + $0x178] sm:$0xff]  ;;  %v2839_v48 = vld [vmem:[%s3517_s6 + $0x188] sm:$0xff] }
 0x2ad   :  { %v364_v7 = vpack.c.bf16 %v360_v50, %v359_v49  ;;  %2209 = vmatpush3.bf16.msra.mxu1 %v362_v35  ;;  %968 = vperm.xlu1 %2342, %v2734_v21   ;;  %v2360_v35 = vld [vmem:[%s3520_s4 + $0x28] sm:$0xff]   ;;  %v2844_v49 = vld [vmem:[%s3517_s6 + $0x1a0] sm:$0xff]  ;;  %v2851_v50 = vld [vmem:[%s3517_s6 + $0x198] sm:$0xff] }
 0x2ae   :  { %v363_v9 = vpack.c.bf16 %v358_v60, %v357_v51  ;;  %v2856_v51 = vld [vmem:[%s3517_s6 + $0x1b0] sm:$0xff]  ;;  %v2863_v60 = vld [vmem:[%s3517_s6 + $0x1a8] sm:$0xff] }
 0x2b0   :  { %2210 = vmatprep.subr.bf16.mxu1 %v363_v9  ;;  %993 = vperm.xlu0 %2343, %v2755_v29  }
 0x2b1   :  { %2211 = vmatpush3.bf16.msra.mxu1 %v363_v9  ;;  %978 = vperm.xlu1 %2342, %v2750_v24   ;;  %v2875_v9 = vld [vmem:[%s3517_s6 + $0x1b8] sm:$0xff] }
 0x2b2   :  { %2212 = vmatprep.subr.bf16.mxu1 %v364_v7 }
 0x2b4   :  { %1003 = vperm.xlu0 %2343, %v2771_v32  }
 0x2b5   :  { %2213 = vmatpush3.bf16.msra.mxu1 %v364_v7  ;;  %988 = vperm.xlu1 %2342, %v2766_v31   ;;  %v2868_v7 = vld [vmem:[%s3517_s6 + $0x1c0] sm:$0xff] }
 0x2b8   :  { %2215 = vmatmul.mubr.msk.bf16.vlgmr.msra.gmra.mrb[4].mxu1 %vm517_vm5, %v2356_v15  ;;  %1013 = vperm.xlu0 %2343, %v2787_v37   ;;  %v2880_v15 = vld [vmem:[%s3517_s6 + $0x1d0] sm:$0xff] }
 0x2b9   :  { %2218 = vmatprep.mubr.msk.bf16.mxu1 %vm517_vm5, %v2357_v18  ;;  %998 = vperm.xlu1 %2342, %v2782_v36   ;;  %3528 = vst [vmem:[#allocation2_spill] sm:$0xff] %v2880_v15  ;;  %v2887_v18 = vld [vmem:[%s3517_s6 + $0x1c8] sm:$0xff] }
 0x2bc   :  { %1023 = vperm.xlu0 %2343, %v2803_v40  }
 0x2bd   :  { %1008 = vperm.xlu1 %2342, %v2798_v39  }
 0x2c0   :  { %2219 = vmatmul.mubr.msk.bf16.gmra.mrb[8].mxu1 %vm517_vm5, %v2358_v23  ;;  %1033 = vperm.xlu0 %2343, %v2819_v43   ;;  %v2893_v23 = vld [vmem:[%s3517_s6 + $0x1d8] sm:$0xff] }
 0x2c1   :  { %2222 = vmatprep.mubr.msk.bf16.mxu1 %vm517_vm5, %v2359_v30  ;;  %1018 = vperm.xlu1 %2342, %v2814_v42   ;;  %3529 = vst [vmem:[#allocation3_spill] sm:$0xff] %v2893_v23  ;;  %v2899_v30 = vld [vmem:[%s3517_s6 + $0x1e8] sm:$0xff] }
 0x2c2   :  { %3530 = vst [vmem:[#allocation4_spill] sm:$0xff] %v2899_v30 }
 0x2c4   :  { %1043 = vperm.xlu0 %2343, %v2832_v47  }
 0x2c5   :  { %1028 = vperm.xlu1 %2342, %v2827_v46  }
 0x2c8   :  { %2223 = vmatmul.mubr.msk.bf16.gmra.mrb[12].mxu1 %vm517_vm5, %v2360_v35  ;;  %1053 = vperm.xlu0 %2343, %v2844_v49   ;;  %v2905_v35 = vld [vmem:[%s3517_s6 + $0x1f8] sm:$0xff] }
 0x2c9   :  { %2226 = vmatprep.mubr.msk.bf16.mxu1 %vm517_vm5, %v2361_v38  ;;  %1038 = vperm.xlu1 %2342, %v2839_v48   ;;  %3531 = vst [vmem:[#allocation5_spill] sm:$0xff] %v2905_v35  ;;  %v2908_v38 = vpop.permute.xlu1 %404 }
 0x2ca   :  { %3532 = vst [vmem:[#allocation6_spill] sm:$0xff] %v2908_v38  ;;  %v2927_v38 = vpop.permute.xlu0 %399 }
 0x2cc   :  { %1063 = vperm.xlu0 %2343, %v2856_v51  }
 0x2cd   :  { %1048 = vperm.xlu1 %2342, %v2851_v50  }
 0x2d0   :  { %2227 = vmatmul.mubr.msk.bf16.gmra.mrb[16].mxu1 %vm517_vm5, %v2362_v41  ;;  %1073 = vperm.xlu0 %2343, %v2868_v7   ;;  %v2910_v41 = vpop.permute.xlu1 %409 }
 0x2d1   :  { %1058 = vperm.xlu1 %2342, %v2863_v60   ;;  %3533 = vst [vmem:[#allocation7_spill] sm:$0xff] %v2910_v41 }
 0x2d4   :  { %1083 = vperm.xlu0 %2343, %v2880_v15   ;;  %v2924_v15 = vpop.permute.xlu1 %419 }
 0x2d5   :  { %1068 = vperm.xlu1 %2342, %v2875_v9   ;;  %3535 = vst [vmem:[#allocation9_spill] sm:$0xff] %v2924_v15 }
 0x2d8   :  { %v2930_v41 = vpop.permute.xlu1 %429 }
 0x2d9   :  { %1078 = vperm.xlu1 %2342, %v2887_v18  }
 0x2dc   :  { %v2937_v15 = vpop.permute.xlu1 %439 }
 0x2dd   :  { %1088 = vperm.xlu1 %2342, %v2893_v23   ;;  %v2915_v23 = vld [vmem:[%s3517_s6 + $0x1e0] sm:$0xff] }
 0x2de   :  { %3534 = vst [vmem:[#allocation8_spill] sm:$0xff] %v2915_v23  ;;  %1093 = vperm.xlu0 %2343, %v2915_v23   ;;  %v2934_v23 = vpop.permute.xlu0 %414 }
 0x2e1   :  { %1098 = vperm.xlu1 %2342, %v2899_v30   ;;  %v2921_v30 = vld [vmem:[%s3517_s6 + $0x1f0] sm:$0xff] }
 0x2e2   :  { %1103 = vperm.xlu0 %2343, %v2921_v30  }
 0x2e5   :  { %1108 = vperm.xlu1 %2342, %v2905_v35   ;;  %v2402_v35 = vmov 5  }
 0x2e6   :  { %2344 = vset.pattern.permute.xlu0 %v2402_v35 }
 0x2e7   :  { %1658 = vperm.xlu0 %2344, %v2453_v4   ;;  %v2944_v4 = vpop.permute.xlu1 %449 }
 0x2e9   :  { %2345 = vset.pattern.permute.xlu1 %v2402_v35 }
 0x2ea   :  { %1662 = vperm.xlu1 %2345, %v2459_v6   ;;  %v2941_v6 = vpop.permute.xlu0 %424 }
 0x2eb   :  { %1670 = vperm.xlu0 %2344, %v2477_v10   ;;  %v2951_v10 = vpop.permute.xlu1 %459 }
 0x2ee   :  { %1666 = vperm.xlu1 %2345, %v2469_v8   ;;  %v2948_v8 = vpop.permute.xlu0 %434 }
 0x2ef   :  { %1678 = vperm.xlu0 %2344, %v2507_v27  }
 0x2f2   :  { %1674 = vperm.xlu1 %2345, %v2493_v25   ;;  %v2955_v25 = vpop.permute.xlu0 %444 }
 0x2f3   :  { %1686 = vperm.xlu0 %2344, %v2513_v28   ;;  %v2363_v28 = vld [vmem:[%s3521_s5] sm:$0xff]  }
 0x2f4   :  { %2246 = vmatprep.mubr.bf16.mxu0 %v2363_v28 }
 0x2f6   :  { %1682 = vperm.xlu1 %2345, %v2500_v26   ;;  %v2958_v26 = vpop.permute.xlu1 %469  ;;  %v2962_v27 = vpop.permute.xlu0 %454 }
 0x2f7   :  { %1694 = vperm.xlu0 %2344, %v2548_v53  }
 0x2fa   :  { %1690 = vperm.xlu1 %2345, %v2543_v52   ;;  %v2364_v52 = vld [vmem:[%s3521_s5 + $0x90] sm:$0xff]   ;;  %v2971_v53 = vpop.permute.xlu1 %793 }
 0x2fb   :  { %1702 = vperm.xlu0 %2344, %v2560_v55   ;;  %2282 = vmatprep.mubr.bf16.mxu1 %v2364_v52 }
 0x2fe   :  { %1698 = vperm.xlu1 %2345, %v2555_v54   ;;  %v2975_v54 = vpop.permute.xlu0 %464  ;;  %v2978_v55 = vpop.permute.xlu1 %803 }
 0x2ff   :  { %1710 = vperm.xlu0 %2344, %v2572_v57  }
 0x302   :  { %1706 = vperm.xlu1 %2345, %v2567_v56   ;;  %v2982_v56 = vpop.permute.xlu0 %474  ;;  %v2985_v57 = vpop.permute.xlu1 %808 }
 0x303   :  { %1718 = vperm.xlu0 %2344, %v2584_v59  }
 0x306   :  { %1714 = vperm.xlu1 %2345, %v2579_v58   ;;  %v2988_v58 = vpop.permute.xlu0 %798  ;;  %v2992_v59 = vpop.permute.xlu1 %818 }
 0x307   :  { %1726 = vperm.xlu0 %2344, %v2619_v0  }
 0x30a   :  { %1722 = vperm.xlu1 %2345, %v2605_v61   ;;  %v2995_v61 = vpop.permute.xlu0 %813 }
 0x30b   :  { %1734 = vperm.xlu0 %2344, %v2631_v3  }
 0x30e   :  { %1730 = vperm.xlu1 %2345, %v2612_v63   ;;  %v2999_v63 = vpop.permute.xlu1 %828  ;;  %v3002_v0 = vpop.permute.xlu0 %823 }
 0x30f   :  { %1742 = vperm.xlu0 %2344, %v2643_v11  }
 0x312   :  { %1738 = vperm.xlu1 %2345, %v2624_v1   ;;  %v3006_v1 = vpop.permute.xlu1 %838  ;;  %v3009_v3 = vpop.permute.xlu0 %833 }
 0x313   :  { %1750 = vperm.xlu0 %2344, %v2655_v19  }
 0x316   :  { %1746 = vperm.xlu1 %2345, %v2636_v5   ;;  %v3013_v5 = vpop.permute.xlu1 %848  ;;  %v3016_v11 = vpop.permute.xlu0 %843 }
 0x317   :  { %1758 = vperm.xlu0 %2344, %v2667_v33  }
 0x31a   :  { %1754 = vperm.xlu1 %2345, %v2648_v12   ;;  %v3020_v12 = vpop.permute.xlu1 %858  ;;  %v3023_v19 = vpop.permute.xlu0 %853 }
 0x31b   :  { %1766 = vperm.xlu0 %2344, %v2679_v44  }
 0x31e   :  { %1762 = vperm.xlu1 %2345, %v2660_v20   ;;  %v3027_v20 = vpop.permute.xlu1 %868  ;;  %v3030_v33 = vpop.permute.xlu0 %863 }
 0x31f   :  { %1774 = vperm.xlu0 %2344, %v2691_v62  }
 0x322   :  { %1770 = vperm.xlu1 %2345, %v2672_v34   ;;  %v3034_v34 = vpop.permute.xlu1 %878  ;;  %v3037_v44 = vpop.permute.xlu0 %873 }
 0x323   :  { %1782 = vperm.xlu0 %2344, %v2703_v13  }
 0x326   :  { %1778 = vperm.xlu1 %2345, %v2684_v45   ;;  %v3041_v45 = vpop.permute.xlu1 %888  ;;  %v3044_v62 = vpop.permute.xlu0 %883 }
 0x327   :  { %1790 = vperm.xlu0 %2344, %v2718_v16  }
 0x32a   :  { %1786 = vperm.xlu1 %2345, %v2696_v2   ;;  %v3048_v2 = vpop.permute.xlu1 %898  ;;  %v3051_v13 = vpop.permute.xlu0 %893 }
 0x32b   :  { %1798 = vperm.xlu0 %2344, %v2734_v21  }
 0x32e   :  { %1794 = vperm.xlu1 %2345, %v2708_v14   ;;  %v3055_v14 = vpop.permute.xlu1 %908  ;;  %v3058_v16 = vpop.permute.xlu0 %903 }
 0x32f   :  { %1806 = vperm.xlu0 %2344, %v2750_v24  }
 0x332   :  { %1802 = vperm.xlu1 %2345, %v2723_v17   ;;  %v3062_v17 = vpop.permute.xlu1 %918  ;;  %v3065_v21 = vpop.permute.xlu0 %913 }
 0x333   :  { %1814 = vperm.xlu0 %2344, %v2766_v31   ;;  %3536 = vst [vmem:[#allocation10_spill] sm:$0xff] %v3062_v17 }
 0x336   :  { %1810 = vperm.xlu1 %2345, %v2739_v22   ;;  %v3537_v22 = vld [vmem:[#allocation2_spill] sm:$0xff]  ;;  %v3069_v24 = vpop.permute.xlu1 %928  ;;  %v3072_v31 = vpop.permute.xlu0 %923 }
 0x337   :  { %1822 = vperm.xlu0 %2344, %v2782_v36   ;;  %3538 = vst [vmem:[#allocation2_spill] sm:$0xff] %v3069_v24 }
 0x33a   :  { %1818 = vperm.xlu1 %2345, %v2755_v29   ;;  %v3539_v29 = vld [vmem:[#allocation3_spill] sm:$0xff] }
 0x33b   :  { %1830 = vperm.xlu0 %2344, %v2798_v39   ;;  %3540 = vst [vmem:[#allocation3_spill] sm:$0xff] %v3072_v31 }
 0x33e   :  { %1826 = vperm.xlu1 %2345, %v2771_v32   ;;  %v3541_v32 = vld [vmem:[#allocation8_spill] sm:$0xff] }
 0x33f   :  { %1838 = vperm.xlu0 %2344, %v2814_v42   ;;  %v3543_v42 = vld [vmem:[#allocation4_spill] sm:$0xff] }
 0x342   :  { %1834 = vperm.xlu1 %2345, %v2787_v37   ;;  %v3542_v37 = vld [vmem:[#allocation7_spill] sm:$0xff] }
 0x343   :  { %1846 = vperm.xlu0 %2344, %v2827_v46  }
 0x346   :  { %1842 = vperm.xlu1 %2345, %v2803_v40  }
 0x347   :  { %1854 = vperm.xlu0 %2344, %v2839_v48  }
 0x34a   :  { %1850 = vperm.xlu1 %2345, %v2819_v43  }
 0x34b   :  { %1862 = vperm.xlu0 %2344, %v2851_v50   ;;  %v3545_v50 = vld [vmem:[#allocation6_spill] sm:$0xff] }
 0x34e   :  { %1858 = vperm.xlu1 %2345, %v2832_v47  }
 0x34f   :  { %1870 = vperm.xlu0 %2344, %v2863_v60  }
 0x352   :  { %1866 = vperm.xlu1 %2345, %v2844_v49   ;;  %v3079_v49 = vpop.permute.xlu1 %938 }
 0x353   :  { %1878 = vperm.xlu0 %2344, %v2875_v9   ;;  %3544 = vst [vmem:[#allocation8_spill] sm:$0xff] %v3079_v49  ;;  %v3083_v9 = vpop.permute.xlu0 %933 }
 0x354   :  { %3546 = vst [vmem:[#allocation7_spill] sm:$0xff] %v3083_v9 }
 0x356   :  { %1874 = vperm.xlu1 %2345, %v2856_v51  }
 0x357   :  { %1886 = vperm.xlu0 %2344, %v2887_v18   ;;  %v3547_v18 = vld [vmem:[#allocation5_spill] sm:$0xff] }
 0x35a   :  { %1882 = vperm.xlu1 %2345, %v2868_v7  }
 0x35b   :  { %1894 = vperm.xlu0 %2344, %v3539_v29  }
 0x35e   :  { %1890 = vperm.xlu1 %2345, %v3537_v22  }
 0x35f   :  { %1902 = vperm.xlu0 %2344, %v3543_v42  }
 0x362   :  { %1898 = vperm.xlu1 %2345, %v3541_v32   ;;  %v3548_v32 = vld [vmem:[#allocation9_spill] sm:$0xff] }
 0x363   :  { %1910 = vperm.xlu0 %2344, %v3547_v18  }
 0x366   :  { %1906 = vperm.xlu1 %2345, %v2921_v30  }
 0x38b   :  { %v2216_v36 = vpop.f32.mrb[4].mxu1 }
 0x38c   :  { %v585_v39 = vadd.f32 %v2216_v36, %v3542_v37  ;;  %v576_v40 = vpop.f32.mrb[5].mxu1 }
 0x38d   :  { %v577_v43 = vadd.f32 %v576_v40, %v2927_v38  ;;  %v2217_v46 = vpop.f32.mrb[6].mxu1 }
 0x38e   :  { %v588_v47 = vadd.f32 %v2217_v46, %v2934_v23  ;;  %v579_v48 = vpop.f32.mrb[7].mxu1  ;;  %v641_v60 = vmax.f32 %v585_v39, 0.0 }
 0x38f   :  { %v580_v51 = vadd.f32 %v579_v48, %v3545_v50  ;;  %v639_v35 = vmax.f32 %v577_v43, 0.0 }
 0x390   :  { %v642_v7 = vmax.f32 %v588_v47, 0.0 }
 0x391   :  { %v640_v28 = vmax.f32 %v580_v51, 0.0 }
 0x392   :  { %v656_v52 = vpack.c.bf16 %v642_v7, %v641_v60 }
 0x393   :  { %v655_v38 = vpack.c.bf16 %v640_v28, %v639_v35  ;;  %v2220_v22 = vpop.f32.mrb[8].mxu1 }
 0x394   :  { %v601_v23 = vadd.f32 %v2220_v22, %v2930_v41  ;;  %v592_v29 = vpop.f32.mrb[9].mxu1 }
 0x395   :  { %v593_v36 = vadd.f32 %v592_v29, %v3548_v32  ;;  %v2221_v37 = vpop.f32.mrb[10].mxu1  ;;  %2230 = vmatprep.subr.bf16.mxu0 %v655_v38  ;;  %2310 = vmatprep.subr.bf16.mxu1 %v655_v38 }
 0x396   :  { %v604_v30 = vadd.f32 %v2221_v37, %v2948_v8  ;;  %v595_v39 = vpop.f32.mrb[11].mxu1  ;;  %2231 = vmatpush3.bf16.msra.mxu0 %v655_v38  ;;  %2318 = vmatpush3.bf16.msra.mxu1 %v655_v38  ;;  %v645_v42 = vmax.f32 %v601_v23, 0.0 }
 0x397   :  { %v596_v40 = vadd.f32 %v595_v39, %v2941_v6  ;;  %2232 = vmatprep.subr.bf16.mxu0 %v656_v52  ;;  %2311 = vmatprep.subr.bf16.mxu1 %v656_v52  ;;  %v643_v46 = vmax.f32 %v593_v36, 0.0 }
 0x398   :  { %v646_v43 = vmax.f32 %v604_v30, 0.0 }
 0x399   :  { %v644_v47 = vmax.f32 %v596_v40, 0.0 }
 0x39a   :  { %v658_v41 = vpack.c.bf16 %v646_v43, %v645_v42  ;;  %2233 = vmatpush3.bf16.msra.mxu0 %v656_v52  ;;  %2319 = vmatpush3.bf16.msra.mxu1 %v656_v52 }
 0x39b   :  { %v657_v48 = vpack.c.bf16 %v644_v47, %v643_v46  ;;  %v2224_v50 = vpop.f32.mrb[12].mxu1  ;;  %v2367_v46 = vld [vmem:[%s3521_s5 + $0x10] sm:$0xff]   ;;  %v2368_v47 = vld [vmem:[%s3521_s5 + $0xa0] sm:$0xff]  }
 0x39c   :  { %v617_v51 = vadd.f32 %v2224_v50, %v2944_v4  ;;  %v608_v60 = vpop.f32.mrb[13].mxu1  ;;  %v2371_v50 = vld [vmem:[%s3521_s5 + $0x20] sm:$0xff]  }
 0x39d   :  { %v609_v8 = vadd.f32 %v608_v60, %v2937_v15  ;;  %v2225_v7 = vpop.f32.mrb[14].mxu1  ;;  %2234 = vmatprep.subr.bf16.mxu0 %v657_v48  ;;  %2312 = vmatprep.subr.bf16.mxu1 %v657_v48  ;;  %v2373_v60 = vld [vmem:[%s3521_s5 + $0x28] sm:$0xff]  }
 0x39e   :  { %v620_v6 = vadd.f32 %v2225_v7, %v2962_v27  ;;  %v611_v18 = vpop.f32.mrb[15].mxu1  ;;  %2235 = vmatpush3.bf16.msra.mxu0 %v657_v48  ;;  %2320 = vmatpush3.bf16.msra.mxu1 %v657_v48  ;;  %v649_v28 = vmax.f32 %v617_v51, 0.0  ;;  %v2370_v48 = vld [vmem:[%s3521_s5 + $0xa8] sm:$0xff]   ;;  %v2372_v51 = vld [vmem:[%s3521_s5 + $0xb0] sm:$0xff]  }
 0x39f   :  { %v612_v35 = vadd.f32 %v611_v18, %v2955_v25  ;;  %2236 = vmatprep.subr.bf16.mxu0 %v658_v41  ;;  %2313 = vmatprep.subr.bf16.mxu1 %v658_v41  ;;  %v647_v38 = vmax.f32 %v609_v8, 0.0  ;;  %v2374_v8 = vld [vmem:[%s3521_s5 + $0xb8] sm:$0xff]   ;;  %v2375_v7 = vld [vmem:[%s3521_s5 + $0x30] sm:$0xff]  }
 0x3a0   :  { %v650_v52 = vmax.f32 %v620_v6, 0.0  ;;  %v2376_v6 = vld [vmem:[%s3521_s5 + $0xc0] sm:$0xff]   ;;  %v2377_v18 = vld [vmem:[%s3521_s5 + $0x38] sm:$0xff]  }
 0x3a1   :  { %v648_v22 = vmax.f32 %v612_v35, 0.0  ;;  %v2378_v35 = vld [vmem:[%s3521_s5 + $0xc8] sm:$0xff]  }
 0x3a2   :  { %v660_v4 = vpack.c.bf16 %v650_v52, %v649_v28  ;;  %2237 = vmatpush3.bf16.msra.mxu0 %v658_v41  ;;  %2321 = vmatpush3.bf16.msra.mxu1 %v658_v41  ;;  %v2369_v41 = vld [vmem:[%s3521_s5 + $0x18] sm:$0xff]   ;;  %v2379_v28 = vld [vmem:[%s3521_s5 + $0x40] sm:$0xff]   ;;  %v2380_v52 = vld [vmem:[%s3521_s5 + $0xd0] sm:$0xff]  }
 0x3a3   :  { %v659_v15 = vpack.c.bf16 %v648_v22, %v647_v38  ;;  %v2228_v23 = vpop.f32.mrb[16].mxu1  ;;  %v2381_v38 = vld [vmem:[%s3521_s5 + $0x48] sm:$0xff]   ;;  %v2382_v22 = vld [vmem:[%s3521_s5 + $0xd8] sm:$0xff]  }
 0x3a4   :  { %v633_v29 = vadd.f32 %v2228_v23, %v2958_v26  ;;  %v624_v32 = vpop.f32.mrb[17].mxu1  ;;  %v2385_v23 = vld [vmem:[%s3521_s5 + $0x58] sm:$0xff]  }
 0x3a5   :  { %v625_v27 = vadd.f32 %v624_v32, %v2951_v10  ;;  %v2229_v36 = vpop.f32.mrb[18].mxu1  ;;  %2238 = vmatprep.subr.bf16.mxu0 %v659_v15  ;;  %2314 = vmatprep.subr.bf16.mxu1 %v659_v15  ;;  %v2387_v32 = vld [vmem:[%s3521_s5 + $0x60] sm:$0xff]  }
 0x3a6   :  { %v636_v25 = vadd.f32 %v2229_v36, %v2982_v56  ;;  %v627_v37 = vpop.f32.mrb[19].mxu1  ;;  %2239 = vmatpush3.bf16.msra.mxu0 %v659_v15  ;;  %2322 = vmatpush3.bf16.msra.mxu1 %v659_v15  ;;  %v653_v39 = vmax.f32 %v633_v29, 0.0  ;;  %v2366_v56 = vld [vmem:[%s3521_s5 + $0x98] sm:$0xff]   ;;  %v2384_v15 = vld [vmem:[%s3521_s5 + $0xe0] sm:$0xff]   ;;  %v2386_v29 = vld [vmem:[%s3521_s5 + $0xe8] sm:$0xff]   ;;  %v3170_v36 = vpop.permute.xlu0 %943 }
 0x3a7   :  { %v628_v30 = vadd.f32 %v627_v37, %v2975_v54  ;;  %2240 = vmatprep.subr.bf16.mxu0 %v660_v4  ;;  %2315 = vmatprep.subr.bf16.mxu1 %v660_v4  ;;  %v651_v42 = vmax.f32 %v625_v27, 0.0  ;;  %v2365_v54 = vld [vmem:[%s3521_s5 + $0x8] sm:$0xff]   ;;  %v2388_v27 = vld [vmem:[%s3521_s5 + $0xf0] sm:$0xff]   ;;  %3549 = vst [vmem:[#allocation4_spill] sm:$0xff] %v3170_v36 }
 0x3a8   :  { %v654_v40 = vmax.f32 %v636_v25, 0.0  ;;  %v3172_v25 = vpop.permute.xlu1 %948  ;;  %v2389_v37 = vld [vmem:[%s3521_s5 + $0x68] sm:$0xff]  }
 0x3a9   :  { %v652_v43 = vmax.f32 %v628_v30, 0.0  ;;  %3550 = vst [vmem:[#allocation6_spill] sm:$0xff] %v3172_v25  ;;  %v2390_v30 = vld [vmem:[%s3521_s5 + $0xf8] sm:$0xff]  }
 0x3aa   :  { %v662_v26 = vpack.c.bf16 %v654_v40, %v653_v39  ;;  %2241 = vmatpush3.bf16.msra.mxu0 %v660_v4  ;;  %2323 = vmatpush3.bf16.msra.mxu1 %v660_v4  ;;  %v2383_v4 = vld [vmem:[%s3521_s5 + $0x50] sm:$0xff]   ;;  %v3183_v40 = vpop.permute.xlu0 %953 }
 0x3ab   :  { %v661_v10 = vpack.c.bf16 %v652_v43, %v651_v42  ;;  %v2391_v39 = vld [vmem:[%s3521_s5 + $0x70] sm:$0xff]   ;;  %3551 = vst [vmem:[#allocation5_spill] sm:$0xff] %v3183_v40  ;;  %v2392_v43 = vld [vmem:[%s3521_s5 + $0x78] sm:$0xff]  }
 0x3ac   :  { %v3185_v42 = vpop.permute.xlu1 %958 }
 0x3ad   :  { %2242 = vmatprep.subr.bf16.mxu0 %v661_v10  ;;  %2316 = vmatprep.subr.bf16.mxu1 %v661_v10  ;;  %3552 = vst [vmem:[#allocation9_spill] sm:$0xff] %v3185_v42 }
 0x3ae   :  { %2243 = vmatpush3.bf16.msra.mxu0 %v661_v10  ;;  %2324 = vmatpush3.bf16.msra.mxu1 %v661_v10  ;;  %v3193_v10 = vpop.permute.xlu0 %963 }
 0x3af   :  { %2244 = vmatprep.subr.bf16.mxu0 %v662_v26  ;;  %2317 = vmatprep.subr.bf16.mxu1 %v662_v26  ;;  %3553 = vst [vmem:[#allocation11_spill] sm:$0xff] %v3193_v10 }
 0x3b2   :  { %2245 = vmatpush3.bf16.msra.mxu0 %v662_v26  ;;  %2325 = vmatpush3.bf16.msra.mxu1 %v662_v26  ;;  %v2393_v26 = vld [vmem:[%s3521_s5 + $0x80] sm:$0xff]  }
 0x3b5   :  { %2247 = vmatmul.mubr.bf16.vlgmr.msra.gmra.mrb[12].mxu0 %v2365_v54  ;;  %2283 = vmatmul.mubr.bf16.vlgmr.msra.gmra.mrb[20].mxu1 %v2366_v56  ;;  %v3195_v54 = vpop.permute.xlu1 %968  ;;  %v3197_v56 = vpop.permute.xlu0 %973 }
 0x3b6   :  { %2250 = vmatprep.mubr.bf16.mxu0 %v2367_v46  ;;  %2286 = vmatprep.mubr.bf16.mxu1 %v2368_v47  ;;  %3554 = vst [vmem:[#allocation12_spill] sm:$0xff] %v3195_v54  ;;  %3555 = vst [vmem:[#allocation13_spill] sm:$0xff] %v3197_v56  ;;  %v2394_v46 = vld [vmem:[%s3521_s5 + $0x88] sm:$0xff]  }
 0x3b9   :  { %v3202_v47 = vpop.permute.xlu1 %978 }
 0x3ba   :  { %3556 = vst [vmem:[#allocation14_spill] sm:$0xff] %v3202_v47 }
 0x3bd   :  { %2251 = vmatmul.mubr.bf16.gmra.mrb[16].mxu0 %v2369_v41  ;;  %2287 = vmatmul.mubr.bf16.gmra.mrb[24].mxu1 %v2370_v48  ;;  %v3204_v41 = vpop.permute.xlu0 %983  ;;  %v3206_v48 = vpop.permute.xlu1 %988 }
 0x3be   :  { %2254 = vmatprep.mubr.bf16.mxu0 %v2371_v50  ;;  %2290 = vmatprep.mubr.bf16.mxu1 %v2372_v51  ;;  %3557 = vst [vmem:[#allocation15_spill] sm:$0xff] %v3204_v41  ;;  %3558 = vst [vmem:[#allocation16_spill] sm:$0xff] %v3206_v48 }
 0x3c1   :  { %v3208_v50 = vpop.permute.xlu0 %993  ;;  %v3210_v51 = vpop.permute.xlu1 %998 }
 0x3c2   :  { %3559 = vst [vmem:[#allocation17_spill] sm:$0xff] %v3208_v50  ;;  %3560 = vst [vmem:[#allocation18_spill] sm:$0xff] %v3210_v51 }
 0x3c5   :  { %2255 = vmatmul.mubr.bf16.gmra.mrb[20].mxu0 %v2373_v60  ;;  %2291 = vmatmul.mubr.bf16.gmra.mrb[28].mxu1 %v2374_v8  ;;  %v3212_v60 = vpop.permute.xlu0 %1003  ;;  %v3214_v8 = vpop.permute.xlu1 %1008 }
 0x3c6   :  { %2258 = vmatprep.mubr.bf16.mxu0 %v2375_v7  ;;  %2294 = vmatprep.mubr.bf16.mxu1 %v2376_v6  ;;  %3561 = vst [vmem:[#allocation19_spill] sm:$0xff] %v3212_v60  ;;  %3562 = vst [vmem:[#allocation20_spill] sm:$0xff] %v3214_v8 }
 0x3c9   :  { %v3216_v7 = vpop.permute.xlu0 %1013  ;;  %v3218_v6 = vpop.permute.xlu1 %1018 }
 0x3ca   :  { %3563 = vst [vmem:[#allocation21_spill] sm:$0xff] %v3216_v7  ;;  %3564 = vst [vmem:[#allocation22_spill] sm:$0xff] %v3218_v6 }
 0x3cd   :  { %2259 = vmatmul.mubr.bf16.gmra.mrb[24].mxu0 %v2377_v18  ;;  %2295 = vmatmul.mubr.bf16.gmra.mrb[32].mxu1 %v2378_v35  ;;  %v3220_v18 = vpop.permute.xlu0 %1023  ;;  %v3222_v35 = vpop.permute.xlu1 %1028 }
 0x3ce   :  { %2262 = vmatprep.mubr.bf16.mxu0 %v2379_v28  ;;  %2298 = vmatprep.mubr.bf16.mxu1 %v2380_v52  ;;  %3565 = vst [vmem:[#allocation23_spill] sm:$0xff] %v3220_v18  ;;  %3566 = vst [vmem:[#allocation24_spill] sm:$0xff] %v3222_v35 }
 0x3d1   :  { %v3224_v28 = vpop.permute.xlu0 %1033  ;;  %v3226_v52 = vpop.permute.xlu1 %1038 }
 0x3d2   :  { %3567 = vst [vmem:[#allocation25_spill] sm:$0xff] %v3224_v28  ;;  %3568 = vst [vmem:[#allocation26_spill] sm:$0xff] %v3226_v52 }
 0x3d5   :  { %2263 = vmatmul.mubr.bf16.gmra.mrb[28].mxu0 %v2381_v38  ;;  %2299 = vmatmul.mubr.bf16.gmra.mrb[36].mxu1 %v2382_v22  ;;  %v3228_v38 = vpop.permute.xlu0 %1043  ;;  %v3230_v22 = vpop.permute.xlu1 %1048 }
 0x3d6   :  { %2266 = vmatprep.mubr.bf16.mxu0 %v2383_v4  ;;  %2302 = vmatprep.mubr.bf16.mxu1 %v2384_v15  ;;  %3569 = vst [vmem:[#allocation27_spill] sm:$0xff] %v3228_v38  ;;  %3570 = vst [vmem:[#allocation28_spill] sm:$0xff] %v3230_v22  ;;  %v2403_v4 = vmov 6   ;;  %v1656_v15 = vld [vmem:[%s3517_s6] sm:$0x1] }
 0x3d7   :  { %2346 = vset.pattern.permute.xlu1 %v2403_v4  ;;  %2347 = vset.pattern.permute.xlu0 %v2403_v4 }
 0x3d8   :  { %2048 = vperm.xlu1 %2346, %v1656_v15  }
 0x3dd   :  { %2267 = vmatmul.mubr.bf16.gmra.mrb[32].mxu0 %v2385_v23  ;;  %2303 = vmatmul.mubr.bf16.gmra.mrb[40].mxu1 %v2386_v29  ;;  %v3235_v23 = vpop.permute.xlu0 %1053  ;;  %v3237_v29 = vpop.permute.xlu1 %1058 }
 0x3de   :  { %2270 = vmatprep.mubr.bf16.mxu0 %v2387_v32  ;;  %2306 = vmatprep.mubr.bf16.mxu1 %v2388_v27  ;;  %3571 = vst [vmem:[#allocation29_spill] sm:$0xff] %v3235_v23  ;;  %3572 = vst [vmem:[#allocation30_spill] sm:$0xff] %v3237_v29 }
 0x3e1   :  { %v3239_v32 = vpop.permute.xlu0 %1063  ;;  %v3241_v27 = vpop.permute.xlu1 %1068 }
 0x3e2   :  { %3573 = vst [vmem:[#allocation31_spill] sm:$0xff] %v3239_v32  ;;  %3574 = vst [vmem:[#allocation32_spill] sm:$0xff] %v3241_v27 }
 0x3e5   :  { %2271 = vmatmul.mubr.bf16.gmra.mrb[36].mxu0 %v2389_v37  ;;  %2307 = vmatmul.mubr.bf16.gmra.mrb[44].mxu1 %v2390_v30  ;;  %v3243_v37 = vpop.permute.xlu0 %1073  ;;  %v3245_v30 = vpop.permute.xlu1 %1078 }
 0x3e6   :  { %2274 = vmatprep.mubr.bf16.mxu0 %v2391_v39  ;;  %3575 = vst [vmem:[#allocation33_spill] sm:$0xff] %v3243_v37  ;;  %3576 = vst [vmem:[#allocation34_spill] sm:$0xff] %v3245_v30 }
 0x3e9   :  { %v3247_v39 = vpop.permute.xlu0 %1083 }
 0x3ea   :  { %3577 = vst [vmem:[#allocation35_spill] sm:$0xff] %v3247_v39 }
 0x3ed   :  { %2275 = vmatmul.mubr.bf16.gmra.mrb[40].mxu0 %v2392_v43  ;;  %v3249_v43 = vpop.permute.xlu1 %1088 }
 0x3ee   :  { %2278 = vmatprep.mubr.bf16.mxu0 %v2393_v26  ;;  %3578 = vst [vmem:[#allocation36_spill] sm:$0xff] %v3249_v43  ;;  %v3251_v26 = vpop.permute.xlu0 %1093 }
 0x3ef   :  { %3579 = vst [vmem:[#allocation37_spill] sm:$0xff] %v3251_v26 }
 0x3f2   :  { %v3255_v4 = vpop.permute.xlu0 %1103 }
 0x3f3   :  { %3581 = vst [vmem:[#allocation39_spill] sm:$0xff] %v3255_v4 }
 0x3f5   :  { %2279 = vmatmul.mubr.bf16.gmra.mrb[44].mxu0 %v2394_v46  ;;  %v3253_v46 = vpop.permute.xlu1 %1098 }
 0x3f6   :  { %3580 = vst [vmem:[#allocation38_spill] sm:$0xff] %v3253_v46  ;;  %v1659_v32 = vpop.permute.xlu0 %1658 }
 0x3f9   :  { %v3257_v15 = vpop.permute.xlu1 %1108 }
 0x3fa   :  { %3582 = vst [vmem:[#allocation40_spill] sm:$0xff] %v3257_v15  ;;  %v1671_v27 = vpop.permute.xlu0 %1670 }
 0x3fd   :  { %v1663_v29 = vpop.permute.xlu1 %1662 }
 0x3fe   :  { %v3259_v37 = vpop.permute.xlu0 %1678 }
 0x401   :  { %v1667_v23 = vpop.permute.xlu1 %1666 }
 0x402   :  { %v3263_v39 = vpop.permute.xlu0 %1686 }
 0x405   :  { %v1675_v22 = vpop.permute.xlu1 %1674 }
 0x406   :  { %v3267_v26 = vpop.permute.xlu0 %1694 }
 0x409   :  { %v3261_v30 = vpop.permute.xlu1 %1682 }
 0x40a   :  { %v3271_v4 = vpop.permute.xlu0 %1702 }
 0x40d   :  { %v3265_v43 = vpop.permute.xlu1 %1690 }
 0x40e   :  { %v3275_v38 = vpop.permute.xlu0 %1710 }
 0x411   :  { %v3269_v46 = vpop.permute.xlu1 %1698 }
 0x412   :  { %v3279_v28 = vpop.permute.xlu0 %1718 }
 0x415   :  { %v3273_v15 = vpop.permute.xlu1 %1706 }
 0x416   :  { %v3283_v18 = vpop.permute.xlu0 %1726 }
 0x419   :  { %v3277_v52 = vpop.permute.xlu1 %1714 }
 0x41a   :  { %v3287_v7 = vpop.permute.xlu0 %1734 }
 0x41d   :  { %v3281_v35 = vpop.permute.xlu1 %1722 }
 0x41e   :  { %v3291_v60 = vpop.permute.xlu0 %1742 }
 0x421   :  { %v3285_v6 = vpop.permute.xlu1 %1730 }
 0x422   :  { %v3295_v50 = vpop.permute.xlu0 %1750 }
 0x423   :  { %3583 = vst [vmem:[#allocation41_spill] sm:$0xff] %v3295_v50 }
 0x425   :  { %v3289_v8 = vpop.permute.xlu1 %1738 }
 0x429   :  { %v3293_v51 = vpop.permute.xlu1 %1746 }
 0x42d   :  { %v3309_v50 = vpop.permute.xlu1 %1754 }
 0x488   :  { %v2248_v48 = vpop.f32.mrb[12].mxu0  ;;  %v3297_v41 = vpop.f32.mrb[20].mxu1 }
 0x489   :  { %3584 = vst [vmem:[#allocation42_spill] sm:$0xff] %v3297_v41  ;;  %v1337_v47 = vpop.f32.mrb[13].mxu0  ;;  %v3299_v56 = vpop.f32.mrb[21].mxu1  ;;  %v1346_v54 = vadd.f32 %v2248_v48, %v2978_v55 }
 0x48a   :  { %3585 = vst [vmem:[#allocation43_spill] sm:$0xff] %v3299_v56  ;;  %v1338_v42 = vadd.f32 %v1337_v47, %v2971_v53  ;;  %v2249_v10 = vpop.f32.mrb[14].mxu0  ;;  %v3303_v40 = vpop.f32.mrb[22].mxu1 }
 0x48b   :  { %3586 = vst [vmem:[#allocation44_spill] sm:$0xff] %v3303_v40  ;;  %v1349_v25 = vadd.f32 %v2249_v10, %v2985_v57  ;;  %v1340_v49 = vpop.f32.mrb[15].mxu0  ;;  %v3306_v36 = vpop.f32.mrb[23].mxu1  ;;  %v1594_v24 = vmax.f32 %v1346_v54, 0.0 }
 0x48c   :  { %3587 = vst [vmem:[#allocation45_spill] sm:$0xff] %v3306_v36  ;;  %v1592_v9 = vmax.f32 %v1338_v42, 0.0  ;;  %v1341_v17 = vadd.f32 %v1340_v49, %v2988_v58  ;;  %v3311_v56 = vpop.permute.xlu0 %1758 }
 0x48d   :  { %3588 = vst [vmem:[#allocation46_spill] sm:$0xff] %v3311_v56  ;;  %v1595_v55 = vmax.f32 %v1349_v25, 0.0  ;;  %v1915_v10 = vmul.f32 %v1667_v23, %v1594_v24 }
 0x48e   :  { %v1593_v41 = vmax.f32 %v1341_v17, 0.0  ;;  %v1913_v48 = vmul.f32 %v1659_v32, %v1592_v9 }
 0x48f   :  { %v1916_v54 = vmul.f32 %v1671_v27, %v1595_v55 }
 0x490   :  { %v1914_v53 = vmul.f32 %v1663_v29, %v1593_v41  ;;  %v2252_v47 = vpop.f32.mrb[16].mxu0  ;;  %v3313_v31 = vpop.f32.mrb[24].mxu1 }
 0x491   :  { %3589 = vst [vmem:[#allocation47_spill] sm:$0xff] %v3313_v31  ;;  %v1353_v40 = vpop.f32.mrb[17].mxu0  ;;  %v3315_v57 = vpop.f32.mrb[25].mxu1  ;;  %v1362_v42 = vadd.f32 %v2252_v47, %v3002_v0 }
 0x492   :  { %v1977_v36 = vadd.f32 %v1914_v53, %v1913_v48  ;;  %v1354_v58 = vadd.f32 %v1353_v40, %v2995_v61  ;;  %v2253_v17 = vpop.f32.mrb[18].mxu0  ;;  %v3319_v49 = vpop.f32.mrb[26].mxu1 }
 0x493   :  { %v1356_v56 = vpop.f32.mrb[19].mxu0  ;;  %v3321_v25 = vpop.f32.mrb[27].mxu1  ;;  %v1365_v29 = vadd.f32 %v2253_v17, %v2999_v63  ;;  %v1598_v31 = vmax.f32 %v1362_v42, 0.0 }
 0x494   :  { %v1978_v9 = vadd.f32 %v1977_v36, %v1915_v10  ;;  %v1596_v41 = vmax.f32 %v1354_v58, 0.0  ;;  %v1357_v32 = vadd.f32 %v1356_v56, %v2992_v59  ;;  %v3325_v0 = vpop.permute.xlu1 %1762  ;;  %v3327_v61 = vpop.permute.xlu0 %1766 }
 0x495   :  { %v1599_v53 = vmax.f32 %v1365_v29, 0.0  ;;  %v1919_v59 = vmul.f32 %v3261_v30, %v1598_v31 }
 0x496   :  { %v1917_v24 = vmul.f32 %v1675_v22, %v1596_v41  ;;  %v1979_v23 = vadd.f32 %v1978_v9, %v1916_v54  ;;  %v1597_v48 = vmax.f32 %v1357_v32, 0.0 }
 0x498   :  { %v1980_v40 = vadd.f32 %v1979_v23, %v1917_v24  ;;  %v1918_v27 = vmul.f32 %v3259_v37, %v1597_v48  ;;  %v2256_v55 = vpop.f32.mrb[20].mxu0  ;;  %v3330_v47 = vpop.f32.mrb[28].mxu1  ;;  %v1920_v37 = vmul.f32 %v3263_v39, %v1599_v53 }
 0x499   :  { %v1369_v36 = vpop.f32.mrb[21].mxu0  ;;  %v3332_v10 = vpop.f32.mrb[29].mxu1  ;;  %v1378_v58 = vadd.f32 %v2256_v55, %v3016_v11 }
 0x49a   :  { %v1981_v63 = vadd.f32 %v1980_v40, %v1918_v27  ;;  %v1370_v56 = vadd.f32 %v1369_v36, %v3009_v3  ;;  %v2257_v22 = vpop.f32.mrb[22].mxu0  ;;  %v3336_v42 = vpop.f32.mrb[30].mxu1 }
 0x49b   :  { %v1372_v17 = vpop.f32.mrb[23].mxu0  ;;  %v3339_v54 = vpop.f32.mrb[31].mxu1  ;;  %v1381_v29 = vadd.f32 %v2257_v22, %v3013_v5  ;;  %v1602_v23 = vmax.f32 %v1378_v58, 0.0 }
 0x49c   :  { %v1982_v9 = vadd.f32 %v1981_v63, %v1919_v59  ;;  %v1600_v41 = vmax.f32 %v1370_v56, 0.0  ;;  %v1373_v32 = vadd.f32 %v1372_v17, %v3006_v1  ;;  %v3345_v3 = vpop.permute.xlu1 %1770  ;;  %v3347_v24 = vpop.permute.xlu0 %1774 }
 0x49d   :  { %v1603_v39 = vmax.f32 %v1381_v29, 0.0  ;;  %v1923_v59 = vmul.f32 %v3269_v46, %v1602_v23 }
 0x49e   :  { %v1921_v31 = vmul.f32 %v3265_v43, %v1600_v41  ;;  %v1983_v30 = vadd.f32 %v1982_v9, %v1920_v37  ;;  %v1601_v11 = vmax.f32 %v1373_v32, 0.0 }
 0x49f   :  { %v1924_v37 = vmul.f32 %v3271_v4, %v1603_v39 }
 0x4a0   :  { %v1984_v48 = vadd.f32 %v1983_v30, %v1921_v31  ;;  %v2260_v40 = vpop.f32.mrb[24].mxu0  ;;  %v3349_v27 = vpop.f32.mrb[32].mxu1  ;;  %v1922_v53 = vmul.f32 %v3267_v26, %v1601_v11 }
 0x4a1   :  { %v1385_v55 = vpop.f32.mrb[25].mxu0  ;;  %v3352_v5 = vpop.f32.mrb[33].mxu1  ;;  %v1394_v56 = vadd.f32 %v2260_v40, %v3030_v33 }
 0x4a2   :  { %v1386_v1 = vadd.f32 %v1385_v55, %v3023_v19  ;;  %v2261_v43 = vpop.f32.mrb[26].mxu0  ;;  %v3355_v36 = vpop.f32.mrb[34].mxu1  ;;  %v1985_v63 = vadd.f32 %v1984_v48, %v1922_v53 }
 0x4a3   :  { %v1388_v22 = vpop.f32.mrb[27].mxu0  ;;  %v3359_v58 = vpop.f32.mrb[35].mxu1  ;;  %v1397_v9 = vadd.f32 %v2261_v43, %v3027_v20  ;;  %v1606_v46 = vmax.f32 %v1394_v56, 0.0 }
 0x4a4   :  { %v1604_v17 = vmax.f32 %v1386_v1, 0.0  ;;  %v1986_v26 = vadd.f32 %v1985_v63, %v1923_v59  ;;  %v1389_v41 = vadd.f32 %v1388_v22, %v3020_v12  ;;  %v3365_v29 = vpop.permute.xlu1 %1778  ;;  %v3367_v32 = vpop.permute.xlu0 %1782 }
 0x4a5   :  { %v1607_v48 = vmax.f32 %v1397_v9, 0.0  ;;  %v1927_v53 = vmul.f32 %v3277_v52, %v1606_v46 }
 0x4a6   :  { %v1925_v19 = vmul.f32 %v3273_v15, %v1604_v17  ;;  %v1987_v31 = vadd.f32 %v1986_v26, %v1924_v37  ;;  %v1605_v33 = vmax.f32 %v1389_v41, 0.0 }
 0x4a7   :  { %v1928_v56 = vmul.f32 %v3279_v28, %v1607_v48 }
 0x4a8   :  { %v2264_v30 = vpop.f32.mrb[28].mxu0  ;;  %v3369_v23 = vpop.f32.mrb[36].mxu1  ;;  %v1988_v11 = vadd.f32 %v1987_v31, %v1925_v19  ;;  %v1926_v4 = vmul.f32 %v3275_v38, %v1605_v33 }
 0x4a9   :  { %v1401_v40 = vpop.f32.mrb[29].mxu0  ;;  %v3372_v20 = vpop.f32.mrb[37].mxu1  ;;  %v1410_v1 = vadd.f32 %v2264_v30, %v3044_v62 }
 0x4aa   :  { %v1402_v12 = vadd.f32 %v1401_v40, %v3037_v44  ;;  %v2265_v15 = vpop.f32.mrb[30].mxu0  ;;  %v3375_v39 = vpop.f32.mrb[38].mxu1  ;;  %v1989_v55 = vadd.f32 %v1988_v11, %v1926_v4 }
 0x4ab   :  { %v1404_v43 = vpop.f32.mrb[31].mxu0  ;;  %v3379_v59 = vpop.f32.mrb[39].mxu1  ;;  %v1413_v22 = vadd.f32 %v2265_v15, %v3041_v45  ;;  %v1610_v52 = vmax.f32 %v1410_v1, 0.0 }
 0x4ac   :  { %v1608_v63 = vmax.f32 %v1402_v12, 0.0  ;;  %v1990_v38 = vadd.f32 %v1989_v55, %v1927_v53  ;;  %v1405_v17 = vadd.f32 %v1404_v43, %v3034_v34  ;;  %v3385_v37 = vpop.permute.xlu1 %1786  ;;  %v3387_v26 = vpop.permute.xlu0 %1790 }
 0x4ad   :  { %v1611_v31 = vmax.f32 %v1413_v22, 0.0  ;;  %v1931_v11 = vmul.f32 %v3285_v6, %v1610_v52 }
 0x4ae   :  { %v1929_v44 = vmul.f32 %v3281_v35, %v1608_v63  ;;  %v1991_v9 = vadd.f32 %v1990_v38, %v1928_v56  ;;  %v1609_v62 = vmax.f32 %v1405_v17, 0.0 }
 0x4af   :  { %v1932_v53 = vmul.f32 %v3287_v7, %v1611_v31 }
 0x4b0   :  { %v2268_v41 = vpop.f32.mrb[32].mxu0  ;;  %v3389_v19 = vpop.f32.mrb[40].mxu1  ;;  %v1992_v46 = vadd.f32 %v1991_v9, %v1929_v44  ;;  %v1930_v28 = vmul.f32 %v3283_v18, %v1609_v62 }
 0x4b1   :  { %v1417_v33 = vpop.f32.mrb[33].mxu0  ;;  %v3392_v45 = vpop.f32.mrb[41].mxu1  ;;  %v1426_v4 = vadd.f32 %v2268_v41, %v3058_v16 }
 0x4b2   :  { %v1418_v34 = vadd.f32 %v1417_v33, %v3051_v13  ;;  %v2269_v35 = vpop.f32.mrb[34].mxu0  ;;  %v3395_v30 = vpop.f32.mrb[42].mxu1  ;;  %v1993_v48 = vadd.f32 %v1992_v46, %v1930_v28  ;;  %v3590_v46 = vld [vmem:[#allocation3_spill] sm:$0xff] }
 0x4b3   :  { %v1420_v40 = vpop.f32.mrb[35].mxu0  ;;  %v3399_v12 = vpop.f32.mrb[43].mxu1  ;;  %v1429_v55 = vadd.f32 %v2269_v35, %v3055_v14  ;;  %v1614_v6 = vmax.f32 %v1426_v4, 0.0  ;;  %v3592_v4 = vld [vmem:[#allocation2_spill] sm:$0xff] }
 0x4b4   :  { %v1612_v15 = vmax.f32 %v1418_v34, 0.0  ;;  %v1994_v18 = vadd.f32 %v1993_v48, %v1931_v11  ;;  %v1421_v1 = vadd.f32 %v1420_v40, %v3048_v2  ;;  %v3404_v13 = vpop.permute.xlu1 %1794  ;;  %v3407_v63 = vpop.permute.xlu0 %1798 }
 0x4b5   :  { %v1615_v44 = vmax.f32 %v1429_v55, 0.0 }
 0x4b6   :  { %v1933_v43 = vmul.f32 %v3289_v8, %v1612_v15  ;;  %v1995_v56 = vadd.f32 %v1994_v18, %v1932_v53  ;;  %v1613_v16 = vmax.f32 %v1421_v1, 0.0  ;;  %v1935_v8 = vmul.f32 %v3293_v51, %v1614_v6 }
 0x4b8   :  { %v2272_v38 = vpop.f32.mrb[36].mxu0  ;;  %v3409_v22 = vpop.f32.mrb[44].mxu1  ;;  %v1996_v17 = vadd.f32 %v1995_v56, %v1933_v43  ;;  %v1934_v7 = vmul.f32 %v3291_v60, %v1613_v16  ;;  %v3591_v60 = vld [vmem:[#allocation41_spill] sm:$0xff]  ;;  %v3594_v16 = vld [vmem:[#allocation46_spill] sm:$0xff] }
 0x4b9   :  { %v1433_v52 = vpop.f32.mrb[37].mxu0  ;;  %v3412_v14 = vpop.f32.mrb[45].mxu1  ;;  %v1442_v31 = vadd.f32 %v2272_v38, %v3590_v46  ;;  %v1936_v11 = vmul.f32 %v3591_v60, %v1615_v44  ;;  %v3595_v44 = vld [vmem:[#allocation7_spill] sm:$0xff] }
 0x4ba   :  { %v1434_v2 = vadd.f32 %v1433_v52, %v3065_v21  ;;  %v2273_v9 = vpop.f32.mrb[38].mxu0  ;;  %v3415_v62 = vpop.f32.mrb[46].mxu1  ;;  %v1997_v41 = vadd.f32 %v1996_v17, %v1934_v7  ;;  %v3593_v21 = vld [vmem:[#allocation10_spill] sm:$0xff] }
 0x4bb   :  { %v1436_v28 = vpop.f32.mrb[39].mxu0  ;;  %v3419_v33 = vpop.f32.mrb[47].mxu1  ;;  %v1445_v40 = vadd.f32 %v2273_v9, %v3592_v4  ;;  %v1618_v18 = vmax.f32 %v1442_v31, 0.0  ;;  %v3598_v4 = vld [vmem:[#allocation6_spill] sm:$0xff] }
 0x4bc   :  { %v3421_v34 = vpop.permute.xlu1 %1802  ;;  %v1616_v35 = vmax.f32 %v1434_v2, 0.0  ;;  %v1998_v48 = vadd.f32 %v1997_v41, %v1935_v8  ;;  %v1437_v15 = vadd.f32 %v1436_v28, %v3593_v21  ;;  %v3426_v53 = vpop.permute.xlu0 %1806  ;;  %v3596_v41 = vld [vmem:[#allocation4_spill] sm:$0xff] }
 0x4bd   :  { %v1619_v56 = vmax.f32 %v1445_v40, 0.0  ;;  %v1939_v9 = vmul.f32 %v3325_v0, %v1618_v18 }
 0x4be   :  { %v1937_v51 = vmul.f32 %v3309_v50, %v1616_v35  ;;  %v1999_v55 = vadd.f32 %v1998_v48, %v1936_v11  ;;  %v1617_v1 = vmax.f32 %v1437_v15, 0.0  ;;  %v3597_v35 = vld [vmem:[#allocation8_spill] sm:$0xff] }
 0x4bf   :  { %v1940_v11 = vmul.f32 %v3327_v61, %v1619_v56 }
 0x4c0   :  { %v2276_v43 = vpop.f32.mrb[40].mxu0  ;;  %v2000_v6 = vadd.f32 %v1999_v55, %v1937_v51  ;;  %v1938_v38 = vmul.f32 %v3594_v16, %v1617_v1  ;;  %v3430_v7 = vpop.permute.xlu1 %1810 }
 0x4c1   :  { %v1449_v17 = vpop.f32.mrb[41].mxu0  ;;  %v1458_v46 = vadd.f32 %v2276_v43, %v3596_v41  ;;  %v3435_v31 = vpop.permute.xlu0 %1814  ;;  %v3601_v41 = vld [vmem:[#allocation9_spill] sm:$0xff] }
 0x4c2   :  { %v1450_v52 = vadd.f32 %v1449_v17, %v3595_v44  ;;  %v2277_v2 = vpop.f32.mrb[42].mxu0  ;;  %v2001_v8 = vadd.f32 %v2000_v6, %v1938_v38  ;;  %v3599_v17 = vld [vmem:[#allocation5_spill] sm:$0xff] }
 0x4c3   :  { %v1452_v50 = vpop.f32.mrb[43].mxu0  ;;  %v1461_v40 = vadd.f32 %v2277_v2, %v3598_v4  ;;  %v1622_v51 = vmax.f32 %v1458_v46, 0.0  ;;  %v3600_v2 = vld [vmem:[#allocation11_spill] sm:$0xff]  ;;  %v3603_v4 = vld [vmem:[#allocation13_spill] sm:$0xff] }
 0x4c4   :  { %v1620_v28 = vmax.f32 %v1450_v52, 0.0  ;;  %v1453_v60 = vadd.f32 %v1452_v50, %v3597_v35  ;;  %v2002_v48 = vadd.f32 %v2001_v8, %v1939_v9  ;;  %v1819_v0 = vpop.permute.xlu1 %1818 }
 0x4c5   :  { %v1623_v6 = vmax.f32 %v1461_v40, 0.0  ;;  %v1823_v38 = vpop.permute.xlu0 %1822  ;;  %v1943_v61 = vmul.f32 %v3365_v29, %v1622_v51  ;;  %v3604_v40 = vld [vmem:[#allocation43_spill] sm:$0xff] }
 0x4c6   :  { %v1941_v21 = vmul.f32 %v3345_v3, %v1620_v28  ;;  %v1621_v15 = vmax.f32 %v1453_v60, 0.0  ;;  %v2003_v55 = vadd.f32 %v2002_v48, %v1940_v11  ;;  %v3602_v28 = vld [vmem:[#allocation12_spill] sm:$0xff] }
 0x4c7   :  { %v1944_v50 = vmul.f32 %v3367_v32, %v1623_v6  ;;  %v3607_v6 = vld [vmem:[#allocation15_spill] sm:$0xff] }
 0x4c8   :  { %v1942_v18 = vmul.f32 %v3347_v24, %v1621_v15  ;;  %v2280_v1 = vpop.f32.mrb[44].mxu0  ;;  %v2004_v43 = vadd.f32 %v2003_v55, %v1941_v21  ;;  %v1827_v60 = vpop.permute.xlu1 %1826  ;;  %v1482_v21 = vadd.f32 %v3604_v40, %v3603_v4  ;;  %v3612_v4 = vld [vmem:[#allocation18_spill] sm:$0xff] }
 0x4c9   :  { %v1465_v16 = vpop.f32.mrb[45].mxu0  ;;  %v1474_v9 = vadd.f32 %v2280_v1, %v3600_v2  ;;  %v1831_v51 = vpop.permute.xlu0 %1830  ;;  %v3606_v1 = vld [vmem:[#allocation45_spill] sm:$0xff]  ;;  %v3609_v2 = vld [vmem:[#allocation16_spill] sm:$0xff]  ;;  %v1501_v40 = vadd.f32 %v3321_v25, %v3612_v4 }
 0x4ca   :  { %v1466_v44 = vadd.f32 %v1465_v16, %v3599_v17  ;;  %v2281_v52 = vpop.f32.mrb[46].mxu0  ;;  %v2005_v56 = vadd.f32 %v2004_v43, %v1942_v18  ;;  %v3605_v18 = vld [vmem:[#allocation14_spill] sm:$0xff]  ;;  %v3616_v25 = vld [vmem:[#allocation21_spill] sm:$0xff] }
 0x4cb   :  { %v1468_v3 = vpop.f32.mrb[47].mxu0  ;;  %v1477_v35 = vadd.f32 %v2281_v52, %v3602_v28  ;;  %v1626_v29 = vmax.f32 %v1474_v9, 0.0  ;;  %v1485_v43 = vadd.f32 %v3606_v1, %v3605_v18  ;;  %v3608_v17 = vld [vmem:[#allocation42_spill] sm:$0xff]  ;;  %v1628_v52 = vmax.f32 %v1482_v21, 0.0  ;;  %v3611_v28 = vld [vmem:[#allocation17_spill] sm:$0xff] }
 0x4cc   :  { %v1624_v8 = vmax.f32 %v1466_v44, 0.0  ;;  %v1469_v46 = vadd.f32 %v1468_v3, %v3601_v41  ;;  %v2006_v24 = vadd.f32 %v2005_v56, %v1943_v61  ;;  %v1490_v44 = vadd.f32 %v3608_v17, %v3607_v6  ;;  %v1835_v56 = vpop.permute.xlu1 %1834  ;;  %v3610_v3 = vld [vmem:[#allocation44_spill] sm:$0xff]  ;;  %v3620_v4 = vld [vmem:[#allocation25_spill] sm:$0xff] }
 0x4cd   :  { %v1627_v32 = vmax.f32 %v1477_v35, 0.0  ;;  %v1493_v9 = vadd.f32 %v3610_v3, %v3609_v2  ;;  %v1498_v35 = vadd.f32 %v3315_v57, %v3611_v28  ;;  %v3615_v57 = vld [vmem:[#allocation20_spill] sm:$0xff]  ;;  %v1633_v6 = vmax.f32 %v1501_v40, 0.0  ;;  %v3617_v3 = vld [vmem:[#allocation22_spill] sm:$0xff] }
 0x4ce   :  { %v1945_v11 = vmul.f32 %v3385_v37, %v1624_v8  ;;  %v1625_v48 = vmax.f32 %v1469_v46, 0.0  ;;  %v2007_v15 = vadd.f32 %v2006_v24, %v1944_v50  ;;  %v1947_v37 = vmul.f32 %v3404_v13, %v1626_v29  ;;  %v1839_v46 = vpop.permute.xlu0 %1838 }
 0x4cf   :  { %v1629_v8 = vmax.f32 %v1485_v43, 0.0  ;;  %v1948_v41 = vmul.f32 %v3407_v63, %v1627_v32  ;;  %v1630_v50 = vmax.f32 %v1490_v44, 0.0  ;;  %v1949_v24 = vmul.f32 %v3421_v34, %v1628_v52  ;;  %v3613_v63 = vld [vmem:[#allocation19_spill] sm:$0xff] }
 0x4d0   :  { %v1946_v55 = vmul.f32 %v3387_v26, %v1625_v48  ;;  %v2008_v16 = vadd.f32 %v2007_v15, %v1945_v11  ;;  %v1631_v48 = vmax.f32 %v1493_v9, 0.0  ;;  %v1843_v29 = vpop.permute.xlu1 %1842  ;;  %v1632_v1 = vmax.f32 %v1498_v35, 0.0 }
 0x4d1   :  { %v1950_v13 = vmul.f32 %v3426_v53, %v1629_v8  ;;  %v1951_v15 = vmul.f32 %v3430_v7, %v1630_v50  ;;  %v1509_v32 = vadd.f32 %v3319_v49, %v3615_v57  ;;  %v1514_v52 = vadd.f32 %v3332_v10, %v3616_v25 }
 0x4d2   :  { %v2009_v61 = vadd.f32 %v2008_v16, %v1946_v55  ;;  %v3614_v55 = vld [vmem:[#allocation47_spill] sm:$0xff]  ;;  %v1847_v34 = vpop.permute.xlu0 %1846  ;;  %v1952_v16 = vmul.f32 %v3435_v31, %v1631_v48  ;;  %v1953_v44 = vmul.f32 %v1819_v0, %v1632_v1  ;;  %v1954_v2 = vmul.f32 %v1823_v38, %v1633_v6  ;;  %v3619_v0 = vld [vmem:[#allocation24_spill] sm:$0xff] }
 0x4d3   :  { %v1506_v18 = vadd.f32 %v3614_v55, %v3613_v63  ;;  %v1517_v9 = vadd.f32 %v3339_v54, %v3617_v3  ;;  %v1636_v50 = vmax.f32 %v1514_v52, 0.0  ;;  %v1525_v35 = vadd.f32 %v3336_v42, %v3619_v0  ;;  %v3621_v63 = vld [vmem:[#allocation26_spill] sm:$0xff]  ;;  %v3626_v3 = vld [vmem:[#allocation31_spill] sm:$0xff] }
 0x4d4   :  { %v2010_v26 = vadd.f32 %v2009_v61, %v1947_v37  ;;  %v1851_v7 = vpop.permute.xlu1 %1850  ;;  %v1635_v61 = vmax.f32 %v1509_v32, 0.0  ;;  %v1530_v54 = vadd.f32 %v3352_v5, %v3620_v4 }
 0x4d5   :  { %v1634_v17 = vmax.f32 %v1506_v18, 0.0  ;;  %v1637_v10 = vmax.f32 %v1517_v9, 0.0  ;;  %v1957_v38 = vmul.f32 %v1835_v56, %v1636_v50  ;;  %v3622_v18 = vld [vmem:[#allocation27_spill] sm:$0xff]  ;;  %v3623_v56 = vld [vmem:[#allocation28_spill] sm:$0xff] }
 0x4d6   :  { %v2011_v11 = vadd.f32 %v2010_v26, %v1948_v41  ;;  %v1855_v41 = vpop.permute.xlu0 %1854  ;;  %v3618_v26 = vld [vmem:[#allocation23_spill] sm:$0xff]  ;;  %v1956_v28 = vmul.f32 %v1831_v51, %v1635_v61  ;;  %v1538_v42 = vadd.f32 %v3349_v27, %v3622_v18  ;;  %v1640_v1 = vmax.f32 %v1530_v54, 0.0 }
 0x4d7   :  { %v1955_v31 = vmul.f32 %v1827_v60, %v1634_v17  ;;  %v1522_v49 = vadd.f32 %v3330_v47, %v3618_v26  ;;  %v1639_v60 = vmax.f32 %v1525_v35, 0.0  ;;  %v1533_v47 = vadd.f32 %v3359_v58, %v3621_v63  ;;  %v3630_v54 = vld [vmem:[#allocation35_spill] sm:$0xff] }
 0x4d8   :  { %v2012_v21 = vadd.f32 %v2011_v11, %v1949_v24  ;;  %v1859_v48 = vpop.permute.xlu1 %1858  ;;  %v1541_v32 = vadd.f32 %v3355_v36, %v3623_v56  ;;  %v1642_v17 = vmax.f32 %v1538_v42, 0.0  ;;  %v1554_v36 = vadd.f32 %v3369_v23, %v3626_v3  ;;  %v3632_v42 = vld [vmem:[#allocation37_spill] sm:$0xff]  ;;  %v3633_v56 = vld [vmem:[#allocation38_spill] sm:$0xff] }
 0x4d9   :  { %v1960_v57 = vmul.f32 %v1847_v34, %v1639_v60  ;;  %v1641_v5 = vmax.f32 %v1533_v47, 0.0 }
 0x4da   :  { %v2013_v43 = vadd.f32 %v2012_v21, %v1950_v13  ;;  %v1638_v13 = vmax.f32 %v1522_v49, 0.0  ;;  %v1863_v21 = vpop.permute.xlu0 %1862  ;;  %v1963_v34 = vmul.f32 %v1859_v48, %v1642_v17  ;;  %v3629_v48 = vld [vmem:[#allocation34_spill] sm:$0xff] }
 0x4db   :  { %v1962_v52 = vmul.f32 %v1855_v41, %v1641_v5  ;;  %v1565_v23 = vadd.f32 %v3399_v12, %v3629_v48  ;;  %v1578_v12 = vadd.f32 %v3412_v14, %v3632_v42 }
 0x4dc   :  { %v2014_v53 = vadd.f32 %v2013_v43, %v1951_v15  ;;  %v1958_v15 = vmul.f32 %v1839_v46, %v1637_v10  ;;  %v1959_v51 = vmul.f32 %v1843_v29, %v1638_v13  ;;  %v1961_v46 = vmul.f32 %v1851_v7, %v1640_v1  ;;  %v3627_v7 = vld [vmem:[#allocation32_spill] sm:$0xff] }
 0x4dd   :  { %v1643_v29 = vmax.f32 %v1541_v32, 0.0  ;;  %v1557_v49 = vadd.f32 %v3375_v39, %v3627_v7  ;;  %v1570_v39 = vadd.f32 %v3389_v19, %v3630_v54  ;;  %v1581_v19 = vadd.f32 %v3419_v33, %v3633_v56 }
 0x4de   :  { %v2015_v37 = vadd.f32 %v2014_v53, %v1952_v16  ;;  %v1867_v16 = vpop.permute.xlu1 %1866  ;;  %v1871_v53 = vpop.permute.xlu0 %1870 }
 0x4df   :  { %v1964_v26 = vmul.f32 %v1863_v21, %v1643_v29  ;;  %v1647_v10 = vmax.f32 %v1557_v49, 0.0  ;;  %v1653_v14 = vmax.f32 %v1581_v19, 0.0 }
 0x4e0   :  { %v2016_v8 = vadd.f32 %v2015_v37, %v1953_v44  ;;  %v3624_v44 = vld [vmem:[#allocation29_spill] sm:$0xff]  ;;  %v3625_v37 = vld [vmem:[#allocation30_spill] sm:$0xff] }
 0x4e1   :  { %v1546_v58 = vadd.f32 %v3372_v20, %v3624_v44  ;;  %v1549_v27 = vadd.f32 %v3379_v59, %v3625_v37 }
 0x4e2   :  { %v2017_v24 = vadd.f32 %v2016_v8, %v1954_v2  ;;  %v1875_v2 = vpop.permute.xlu1 %1874 }
 0x4e3   :  { %v1644_v9 = vmax.f32 %v1546_v58, 0.0  ;;  %v1645_v20 = vmax.f32 %v1549_v27, 0.0  ;;  %v3635_v58 = vld [vmem:[#allocation40_spill] sm:$0xff] }
 0x4e4   :  { %v2018_v11 = vadd.f32 %v2017_v24, %v1955_v31  ;;  %v1879_v31 = vpop.permute.xlu0 %1878  ;;  %v1646_v24 = vmax.f32 %v1554_v36, 0.0 }
 0x4e5   :  { %v1965_v41 = vmul.f32 %v1867_v16, %v1644_v9  ;;  %v1968_v60 = vmul.f32 %v1879_v31, %v1647_v10 }
 0x4e6   :  { %v2019_v40 = vadd.f32 %v2018_v11, %v1956_v28  ;;  %v3628_v28 = vld [vmem:[#allocation33_spill] sm:$0xff]  ;;  %v1883_v35 = vpop.permute.xlu1 %1882  ;;  %v1966_v11 = vmul.f32 %v1871_v53, %v1645_v20  ;;  %v1967_v4 = vmul.f32 %v1875_v2, %v1646_v24  ;;  %v1652_v53 = vmax.f32 %v1578_v12, 0.0 }
 0x4e7   :  { %v1562_v59 = vadd.f32 %v3392_v45, %v3628_v28  ;;  %v1649_v45 = vmax.f32 %v1565_v23, 0.0 }
 0x4e8   :  { %v2020_v55 = vadd.f32 %v2019_v40, %v1957_v38  ;;  %v1887_v38 = vpop.permute.xlu0 %1886 }
 0x4e9   :  { %v1648_v40 = vmax.f32 %v1562_v59, 0.0 }
 0x4ea   :  { %v2021_v43 = vadd.f32 %v2020_v55, %v1958_v15  ;;  %v3631_v15 = vld [vmem:[#allocation36_spill] sm:$0xff]  ;;  %v1891_v55 = vpop.permute.xlu1 %1890 }
 0x4eb   :  { %v1573_v63 = vadd.f32 %v3395_v30, %v3631_v15  ;;  %v1969_v18 = vmul.f32 %v1883_v35, %v1648_v40 }
 0x4ec   :  { %v2022_v6 = vadd.f32 %v2021_v43, %v1959_v51  ;;  %v1650_v51 = vmax.f32 %v1570_v39, 0.0  ;;  %v1895_v43 = vpop.permute.xlu0 %1894 }
 0x4ed   :  { %v1651_v16 = vmax.f32 %v1573_v63, 0.0 }
 0x4ee   :  { %v2023_v25 = vadd.f32 %v2022_v6, %v1960_v57  ;;  %v1970_v57 = vmul.f32 %v1887_v38, %v1649_v45  ;;  %v1971_v5 = vmul.f32 %v1891_v55, %v1650_v51  ;;  %v3634_v6 = vld [vmem:[#allocation39_spill] sm:$0xff] }
 0x4ef   :  { %v1586_v30 = vadd.f32 %v3409_v22, %v3634_v6  ;;  %v1972_v44 = vmul.f32 %v1895_v43, %v1651_v16 }
 0x4f0   :  { %v2024_v61 = vadd.f32 %v2023_v25, %v1961_v46  ;;  %v1899_v46 = vpop.permute.xlu1 %1898  ;;  %v1589_v25 = vadd.f32 %v3415_v62, %v3635_v58 }
 0x4f1   :  { %v1654_v37 = vmax.f32 %v1586_v30, 0.0  ;;  %v1973_v27 = vmul.f32 %v1899_v46, %v1652_v53 }
 0x4f2   :  { %v2025_v8 = vadd.f32 %v2024_v61, %v1962_v52  ;;  %v1903_v52 = vpop.permute.xlu0 %1902  ;;  %v1655_v2 = vmax.f32 %v1589_v25, 0.0 }
 0x4f3   :  { %v1974_v33 = vmul.f32 %v1903_v52, %v1653_v14 }
 0x4f4   :  { %v2026_v50 = vadd.f32 %v2025_v8, %v1963_v34  ;;  %v1907_v3 = vpop.permute.xlu1 %1906 }
 0x4f5   :  { %v1975_v36 = vmul.f32 %v1907_v3, %v1654_v37 }
 0x4f6   :  { %v2027_v0 = vadd.f32 %v2026_v50, %v1964_v26  ;;  %v1911_v22 = vpop.permute.xlu0 %1910 }
 0x4f7   :  { %v1976_v8 = vmul.f32 %v1911_v22, %v1655_v2 }
 0x4f8   :  { %v2028_v13 = vadd.f32 %v2027_v0, %v1965_v41  ;;  %v2049_v24 = vpop.permute.xlu1 %2048 }
 0x4fa   :  { %v2029_v21 = vadd.f32 %v2028_v13, %v1966_v11 }
 0x4fc   :  { %v2030_v47 = vadd.f32 %v2029_v21, %v1967_v4 }
 0x4fe   :  { %v2031_v1 = vadd.f32 %v2030_v47, %v1968_v60 }
 0x500   :  { %v2032_v32 = vadd.f32 %v2031_v1, %v1969_v18 }
 0x502   :  { %v2033_v17 = vadd.f32 %v2032_v32, %v1970_v57 }
 0x504   :  { %v2034_v29 = vadd.f32 %v2033_v17, %v1971_v5 }
 0x506   :  { %v2035_v61 = vadd.f32 %v2034_v29, %v1972_v44 }
 0x508   :  { %v2036_v34 = vadd.f32 %v2035_v61, %v1973_v27 }
 0x50a   :  { %v2037_v9 = vadd.f32 %v2036_v34, %v1974_v33 }
 0x50c   :  { %v2038_v31 = vadd.f32 %v2037_v9, %v1975_v36 }
 0x50e   :  { %v2039_v26 = vadd.f32 %v2038_v31, %v1976_v8 }
 0x510   :  { %v2040_v7 = vrot.slane %v2039_v26, 4 }
 0x512   :  { %v2041_v49 = vadd.f32 %v2040_v7, %v2039_v26 }
 0x514   :  { %v2042_v20 = vrot.slane %v2041_v49, 2 }
 0x516   :  { %v2043_v62 = vadd.f32 %v2042_v20, %v2041_v49 }
 0x518   :  { %v2044_v50 = vrot.slane %v2043_v62, 1 }
 0x51a   :  { %v2045_v41 = vadd.f32 %v2044_v50, %v2043_v62 }
 0x51c   :  { %v2051_v28 = vadd.f32 %v2049_v24, %v2045_v41 }
 0x51e   :  { %2052 = vst [vmem:[%s3522_s7] sm:$0x1] %v2051_v28 }

</bundles_post_ra>
